<compile_context>
chip_gen: v7x
topology: tpu7x:2x2x1
jax: 0.10.0
libtpu: 0.0.40
codegen_flags: <defaults>
</compile_context>

<pallas_src>
import numpy as np
import jax
import jax.numpy as jnp
from jax import lax
from jax.experimental import pallas as pl
from jax.experimental.pallas import tpu as pltpu

OUT_PAD = 128  # lane-dense padded width for the final output row


# ----------------------------------------------------------------------------
# Fused kernel: bidirectional LSTM + attention head + output softmax.
# ----------------------------------------------------------------------------
def _make_fused_kernel(T, H, startidx, endidx):
    H2 = 2 * H

    def kernel(xcat_ref, wih_ref, whh_ref, bg_ref,
               w1a_ref, w1b_ref, b1_ref, w2_ref, b2_ref,
               w3_ref, b3_ref,
               out_ref,
               l2r_buf, r2l_buf, pre_buf):
        # ---- hoisted input projection: one GEMM covers all timesteps & both
        #      directions (block-diagonal W_ih, x_cat = [x | reversed(x)]).
        pre_buf[...] = (
            jnp.dot(xcat_ref[...], wih_ref[...],
                    preferred_element_type=jnp.float32)
            + bg_ref[...])                                     # (T, 8H)

        whh = whh_ref[...]                                     # (2H, 8H)

        def step(t, carry):
            h, c = carry                                       # each (1, 2H)
            gates = pre_buf[pl.ds(t, 1), :] + jnp.dot(
                h, whh, preferred_element_type=jnp.float32)    # (1, 8H)
            # Full-width sigmoid (one EUP pass), tanh only on the g block.
            sig = jax.nn.sigmoid(gates)
            i_g = sig[:, 0:H2]
            f_g = sig[:, H2:2 * H2]
            o_g = sig[:, 3 * H2:4 * H2]
            g_g = jnp.tanh(gates[:, 2 * H2:3 * H2])
            c_new = f_g * c + i_g * g_g
            h_new = o_g * jnp.tanh(c_new)
            # l2r output at step t; r2l output stored position-aligned.
            l2r_buf[pl.ds(t, 1), :] = h_new[:, 0:H]
            r2l_buf[pl.ds(T - 1 - t, 1), :] = h_new[:, H:H2]
            return (h_new, c_new)

        h0 = jnp.zeros((1, H2), jnp.float32)
        c0 = jnp.zeros((1, H2), jnp.float32)
        lax.fori_loop(0, T, step, (h0, c0), unroll=True)

        # ---- attention head, entirely on the VMEM-resident hidden slab.
        # bi[n] = [l2routputs[n] | r2loutputs[T-1-n]]  (position-aligned).
        bi = jnp.concatenate([l2r_buf[...], r2l_buf[...]], axis=1)   # (T, 2H)

        tgt_mean = jnp.mean(bi[startidx:endidx + 1, :],
                            axis=0, keepdims=True)                   # (1, 2H)
        # target-side contribution of input2weight1 computed once (+ bias b1).
        tgt_contrib = (jnp.dot(tgt_mean, w1b_ref[...],
                               preferred_element_type=jnp.float32)
                       + b1_ref[...])                                # (1, A)

        w1a = w1a_ref[...]
        w2 = w2_ref[...]
        b2 = b2_ref[...]

        def head_chunk(chunk):
            # chunk: (n, 2H), n > 0 (static).
            hd = jnp.tanh(jnp.dot(chunk, w1a,
                                  preferred_element_type=jnp.float32)
                          + tgt_contrib)                             # (n, A)
            attn_w = jnp.sum(hd * w2, axis=1, keepdims=True) + b2    # (n, 1)
            # nn.Softmax() with implicit dim -> dim=1 on a (n, 1) tensor
            # (all ones) -- reproduced exactly as in the PyTorch module.
            attn_norm = jax.nn.softmax(attn_w, axis=1)
            return jnp.sum(attn_norm * chunk, axis=0, keepdims=True)  # (1, 2H)

        # Non-target rows are two contiguous chunks of bi (indices static).
        applied = jnp.zeros((1, H2), jnp.float32)
        if startidx > 0:
            applied = applied + head_chunk(bi[0:startidx, :])
        if endidx + 1 < T:
            applied = applied + head_chunk(bi[endidx + 1:T, :])

        logits = (jnp.dot(applied, w3_ref[...],
                          preferred_element_type=jnp.float32)
                  + b3_ref[...])                                     # (1, 128)
        out_ref[...] = jax.nn.softmax(logits, axis=1)

    return kernel


# ----------------------------------------------------------------------------
# Parameter init (deterministic, mirrors nn.LSTM default + init_weights()).
# PyTorch layout, gate order i, f, g, o.
# ----------------------------------------------------------------------------
def init_params(key, embed_dim, hidden_dim, att_hidden_dim, output_dim):
    H = hidden_dim
    k = 1.0 / np.sqrt(H)
    keys = jax.random.split(key, 12)
    u = lambda kk, shape, lim: jax.random.uniform(kk, shape, jnp.float32, -lim, lim)
    return {
        "l2r_wih": u(keys[0], (4 * H, embed_dim), k),
        "l2r_whh": u(keys[1], (4 * H, H), k),
        "l2r_bih": u(keys[2], (4 * H,), k),
        "l2r_bhh": u(keys[3], (4 * H,), k),
        "r2l_wih": u(keys[4], (4 * H, embed_dim), k),
        "r2l_whh": u(keys[5], (4 * H, H), k),
        "r2l_bih": u(keys[6], (4 * H,), k),
        "r2l_bhh": u(keys[7], (4 * H,), k),
        "w1": u(keys[8], (att_hidden_dim, 4 * H), 0.1),   # input2weight1.weight
        "b1": jnp.zeros((att_hidden_dim,), jnp.float32),
        "w2": u(keys[9], (1, att_hidden_dim), 0.1),       # input2weight2.weight
        "b2": jnp.zeros((1,), jnp.float32),
        "w3": u(keys[10], (output_dim, 2 * H), 0.1),      # applied2out.weight
        "b3": jnp.zeros((output_dim,), jnp.float32),
    }


# ----------------------------------------------------------------------------
# One-time weight packing (transposes / bias sums / block-diagonal layout).
# ----------------------------------------------------------------------------
def prepare_kernel_params(params, embed_dim, hidden_dim, output_dim):
    E, H, O = embed_dim, hidden_dim, output_dim
    H2 = 2 * H

    wih_blk = jnp.zeros((2 * E, 8 * H), jnp.float32)
    whh_blk = jnp.zeros((2 * H, 8 * H), jnp.float32)
    b_blk = jnp.zeros((8 * H,), jnp.float32)
    b_l = params["l2r_bih"] + params["l2r_bhh"]
    b_r = params["r2l_bih"] + params["r2l_bhh"]
    for g in range(4):                       # gate order i, f, g, o
        col_l = slice(2 * H * g, 2 * H * g + H)        # l2r lanes of gate g
        col_r = slice(2 * H * g + H, 2 * H * (g + 1))  # r2l lanes of gate g
        row = slice(g * H, (g + 1) * H)
        wih_blk = wih_blk.at[0:E, col_l].set(params["l2r_wih"][row, :].T)
        wih_blk = wih_blk.at[E:2 * E, col_r].set(params["r2l_wih"][row, :].T)
        whh_blk = whh_blk.at[0:H, col_l].set(params["l2r_whh"][row, :].T)
        whh_blk = whh_blk.at[H:2 * H, col_r].set(params["r2l_whh"][row, :].T)
        b_blk = b_blk.at[col_l].set(b_l[row])
        b_blk = b_blk.at[col_r].set(b_r[row])

    w1 = params["w1"]                                   # (A, 4H)
    w1a_t = jnp.transpose(w1[:, 0:H2])                  # inputs half  -> (2H, A)
    w1b_t = jnp.transpose(w1[:, H2:2 * H2])             # target half  -> (2H, A)

    w3_t = jnp.transpose(params["w3"])                  # (2H, O)
    w3_pad = jnp.zeros((H2, OUT_PAD), jnp.float32).at[:, 0:O].set(w3_t)
    b3_pad = jnp.full((1, OUT_PAD), -1e30, jnp.float32).at[0, 0:O].set(params["b3"])

    return {
        "wih_blk": wih_blk, "whh_blk": whh_blk, "b_blk": b_blk.reshape(1, -1),
        "w1a_t": w1a_t, "w1b_t": w1b_t, "b1": params["b1"].reshape(1, -1),
        "w2_row": params["w2"], "b2": params["b2"].reshape(1, 1),
        "w3_pad": w3_pad, "b3_pad": b3_pad,
    }


# ----------------------------------------------------------------------------
# Full forward: light-weight host-side prep (reverse + lane concat) + one
# fused pallas_call.
# ----------------------------------------------------------------------------
def attention_model_forward(words_var, startidx, endidx, kparams,
                            hidden_dim, output_dim):
    # words_var: (T, 1, E), like the PyTorch module (seq, batch=1, embed).
    T = words_var.shape[0]
    H = hidden_dim
    x = words_var[:, 0, :]                    # (T, E)
    rx = x[::-1]                              # reversed sequence
    x_cat = jnp.concatenate([x, rx], axis=1)  # (T, 2E)

    kernel = _make_fused_kernel(T, H, startidx, endidx)
    out_pad = pl.pallas_call(
        kernel,
        out_shape=jax.ShapeDtypeStruct((1, OUT_PAD), jnp.float32),
        scratch_shapes=[
            pltpu.VMEM((T, H), jnp.float32),       # l2r outputs (by position)
            pltpu.VMEM((T, H), jnp.float32),       # r2l outputs (aligned)
            pltpu.VMEM((T, 8 * H), jnp.float32),   # precomputed x @ W_ih + b
        ],
    )(x_cat, kparams["wih_blk"], kparams["whh_blk"], kparams["b_blk"],
      kparams["w1a_t"], kparams["w1b_t"], kparams["b1"],
      kparams["w2_row"], kparams["b2"],
      kparams["w3_pad"], kparams["b3_pad"])

    # TODO(synk): nn.Dropout(p=0) is only applied when is_test=True and is a
    # no-op with pdrop=0, so it is omitted.
    return out_pad[:, :output_dim]            # (1, O)


# ----------------------------------------------------------------------------
# Pure-JAX reference (for correctness check of the Pallas kernel).
# ----------------------------------------------------------------------------
def reference_forward(words_var, startidx, endidx, params, output_dim):
    T = words_var.shape[0]
    x = words_var[:, 0, :]
    rx = x[::-1]

    def lstm_ref(seq, wih, whh, bih, bhh):
        H = whh.shape[1]
        h = jnp.zeros((H,), jnp.float32)
        c = jnp.zeros((H,), jnp.float32)
        outs = []
        for t in range(seq.shape[0]):
            gates = seq[t] @ wih.T + bih + h @ whh.T + bhh
            i = jax.nn.sigmoid(gates[0:H])
            f = jax.nn.sigmoid(gates[H:2 * H])
            g = jnp.tanh(gates[2 * H:3 * H])
            o = jax.nn.sigmoid(gates[3 * H:4 * H])
            c = f * c + i * g
            h = o * jnp.tanh(c)
            outs.append(h)
        return jnp.stack(outs)

    l2r = lstm_ref(x, params["l2r_wih"], params["l2r_whh"],
                   params["l2r_bih"], params["l2r_bhh"])
    r2l = lstm_ref(rx, params["r2l_wih"], params["r2l_whh"],
                   params["r2l_bih"], params["r2l_bhh"])

    leftorder = list(range(startidx)) + list(range(endidx + 1, T))
    rightorder = [T - n - 1 for n in leftorder]
    targetorder = list(range(startidx, endidx + 1))
    r_targetorder = [T - n - 1 for n in targetorder]

    target_cat = jnp.concatenate(
        [l2r[jnp.array(targetorder)], r2l[jnp.array(r_targetorder)]], axis=1)
    target_mean = jnp.mean(target_cat, axis=0, keepdims=True)
    inputs = jnp.concatenate(
        [l2r[jnp.array(leftorder)], r2l[jnp.array(rightorder)]], axis=1)

    it = jnp.concatenate(
        [inputs, jnp.broadcast_to(target_mean,
                                  (inputs.shape[0], target_mean.shape[1]))],
        axis=1)
    hd = jnp.tanh(it @ params["w1"].T + params["b1"])
    attn_w = hd @ params["w2"].T + params["b2"]
    attn_norm_w = jax.nn.softmax(attn_w, axis=1)
    applied = attn_norm_w.T @ inputs
    logits = applied @ params["w3"].T + params["b3"]
    return jax.nn.softmax(logits, axis=1)


if __name__ == "__main__":
    embed_dim, hidden_dim, att_hidden_dim, output_dim = 16, 32, 32, 4
    num_words, startidx, endidx = 8, 2, 4

    key = jax.random.PRNGKey(0)
    k_params, k_words = jax.random.split(key)
    params = init_params(k_params, embed_dim, hidden_dim, att_hidden_dim,
                         output_dim)
    kparams = prepare_kernel_params(params, embed_dim, hidden_dim, output_dim)

    words_var = jax.random.normal(k_words, (num_words, 1, embed_dim),
                                  jnp.float32)

    out = attention_model_forward(words_var, startidx, endidx, kparams,
                                  hidden_dim, output_dim)
    out = jax.block_until_ready(out)

    ref = reference_forward(words_var, startidx, endidx, params, output_dim)
    ref = jax.block_until_ready(ref)

    assert out.shape == (1, output_dim), out.shape
    np.testing.assert_allclose(np.asarray(out), np.asarray(ref),
                               atol=1e-3, rtol=1e-3)
    print("KERNEL_OK")
</pallas_src>

<mosaic_0001>
module attributes {stable_mosaic.version = 11 : i64} {
  func.func @kernel(%arg0: memref<8x32xf32, #tpu.memory_space<vmem>>, %arg1: memref<32x256xf32, #tpu.memory_space<vmem>>, %arg2: memref<64x256xf32, #tpu.memory_space<vmem>>, %arg3: memref<1x256xf32, #tpu.memory_space<vmem>>, %arg4: memref<64x32xf32, #tpu.memory_space<vmem>>, %arg5: memref<64x32xf32, #tpu.memory_space<vmem>>, %arg6: memref<1x32xf32, #tpu.memory_space<vmem>>, %arg7: memref<1x32xf32, #tpu.memory_space<vmem>>, %arg8: memref<1x1xf32, #tpu.memory_space<vmem>>, %arg9: memref<64x128xf32, #tpu.memory_space<vmem>>, %arg10: memref<1x128xf32, #tpu.memory_space<vmem>>, %arg11: memref<1x128xf32, #tpu.memory_space<vmem>>, %arg12: memref<8x32xf32, #tpu.memory_space<vmem>>, %arg13: memref<8x32xf32, #tpu.memory_space<vmem>>, %arg14: memref<8x256xf32, #tpu.memory_space<vmem>>) attributes {dimension_semantics = [], scalar_prefetch = 0 : i64, scratch_operands = 3 : i64, tpu.core_type = #tpu.core_type<tc>} {
    %c0 = arith.constant 0 : index
    %c0_0 = arith.constant 0 : index
    %0 = vector.load %arg0[%c0, %c0_0] : memref<8x32xf32, #tpu.memory_space<vmem>>, vector<8x32xf32>
    %c0_1 = arith.constant 0 : index
    %c0_2 = arith.constant 0 : index
    %1 = vector.load %arg1[%c0_1, %c0_2] : memref<32x256xf32, #tpu.memory_space<vmem>>, vector<32x256xf32>
    %cst = arith.constant dense<0.000000e+00> : vector<8x256xf32>
    %2 = tpu.matmul %0, %1, %cst {dimension_numbers = #tpu.dot_dimension_numbers<[1], [0], [0], [1], [0, 0, 1, 1], [], []>} : vector<8x32xf32>, vector<32x256xf32>, vector<8x256xf32> -> vector<8x256xf32>
    %c0_3 = arith.constant 0 : index
    %c0_4 = arith.constant 0 : index
    %3 = vector.load %arg3[%c0_3, %c0_4] : memref<1x256xf32, #tpu.memory_space<vmem>>, vector<1x256xf32>
    %4 = vector.broadcast %3 : vector<1x256xf32> to vector<8x256xf32>
    %5 = arith.addf %2, %4 : vector<8x256xf32>
    %c0_5 = arith.constant 0 : index
    %c0_6 = arith.constant 0 : index
    %6 = vector.load %arg14[%c0_5, %c0_6] : memref<8x256xf32, #tpu.memory_space<vmem>>, vector<8x256xf32>
    tpu.vector_store %arg14[%c0_5, %c0_6], %5 {strides = array<i32>} : memref<8x256xf32, #tpu.memory_space<vmem>>, vector<8x256xf32>,
    %c0_7 = arith.constant 0 : index
    %c0_8 = arith.constant 0 : index
    %7 = vector.load %arg2[%c0_7, %c0_8] : memref<64x256xf32, #tpu.memory_space<vmem>>, vector<64x256xf32>
    %cst_9 = arith.constant 0.000000e+00 : f32
    %8 = vector.broadcast %cst_9 : f32 to vector<1x64xf32>
    %cst_10 = arith.constant 0.000000e+00 : f32
    %9 = vector.broadcast %cst_10 : f32 to vector<1x64xf32>
    %c0_i32 = arith.constant 0 : i32
    %10 = arith.index_cast %c0_i32 : i32 to index
    %c0_11 = arith.constant 0 : index
    %11 = vector.load %arg14[%10, %c0_11] : memref<8x256xf32, #tpu.memory_space<vmem>>, vector<1x256xf32>
    %cst_12 = arith.constant dense<0.000000e+00> : vector<1x256xf32>
    %12 = tpu.matmul %8, %7, %cst_12 {dimension_numbers = #tpu.dot_dimension_numbers<[1], [0], [0], [1], [0, 0, 1, 1], [], []>} : vector<1x64xf32>, vector<64x256xf32>, vector<1x256xf32> -> vector<1x256xf32>
    %13 = arith.addf %11, %12 : vector<1x256xf32>
    %14 = arith.negf %13 : vector<1x256xf32>
    %15 = math.exp %14 : vector<1x256xf32>
    %cst_13 = arith.constant 1.000000e+00 : f32
    %16 = vector.broadcast %cst_13 : f32 to vector<1x256xf32>
    %17 = arith.addf %16, %15 : vector<1x256xf32>
    %18 = arith.divf %16, %17 : vector<1x256xf32>
    %19 = vector.extract_strided_slice %18 {offsets = [0, 0], sizes = [1, 64], strides = [1, 1]} : vector<1x256xf32> to vector<1x64xf32>
    %20 = vector.extract_strided_slice %18 {offsets = [0, 64], sizes = [1, 64], strides = [1, 1]} : vector<1x256xf32> to vector<1x64xf32>
    %21 = vector.extract_strided_slice %18 {offsets = [0, 192], sizes = [1, 64], strides = [1, 1]} : vector<1x256xf32> to vector<1x64xf32>
    %22 = vector.extract_strided_slice %13 {offsets = [0, 128], sizes = [1, 64], strides = [1, 1]} : vector<1x256xf32> to vector<1x64xf32>
    %23 = math.tanh %22 : vector<1x64xf32>
    %24 = arith.mulf %20, %9 : vector<1x64xf32>
    %25 = arith.mulf %19, %23 : vector<1x64xf32>
    %26 = arith.addf %24, %25 : vector<1x64xf32>
    %27 = math.tanh %26 : vector<1x64xf32>
    %28 = arith.mulf %21, %27 : vector<1x64xf32>
    %29 = vector.extract_strided_slice %28 {offsets = [0, 0], sizes = [1, 32], strides = [1, 1]} : vector<1x64xf32> to vector<1x32xf32>
    %30 = arith.index_cast %c0_i32 : i32 to index
    %c0_14 = arith.constant 0 : index
    %31 = vector.load %arg12[%30, %c0_14] : memref<8x32xf32, #tpu.memory_space<vmem>>, vector<1x32xf32>
    tpu.vector_store %arg12[%30, %c0_14], %29 {strides = array<i32>} : memref<8x32xf32, #tpu.memory_space<vmem>>, vector<1x32xf32>,
    %32 = vector.extract_strided_slice %28 {offsets = [0, 32], sizes = [1, 32], strides = [1, 1]} : vector<1x64xf32> to vector<1x32xf32>
    %c7_i32 = arith.constant 7 : i32
    %33 = arith.subi %c7_i32, %c0_i32 : i32
    %34 = arith.index_cast %33 : i32 to index
    %c0_15 = arith.constant 0 : index
    %35 = vector.load %arg13[%34, %c0_15] : memref<8x32xf32, #tpu.memory_space<vmem>>, vector<1x32xf32>
    tpu.vector_store %arg13[%34, %c0_15], %32 {strides = array<i32>} : memref<8x32xf32, #tpu.memory_space<vmem>>, vector<1x32xf32>,
    %c1_i32 = arith.constant 1 : i32
    %36 = arith.index_cast %c1_i32 : i32 to index
    %c0_16 = arith.constant 0 : index
    %37 = vector.load %arg14[%36, %c0_16] : memref<8x256xf32, #tpu.memory_space<vmem>>, vector<1x256xf32>
    %cst_17 = arith.constant dense<0.000000e+00> : vector<1x256xf32>
    %38 = tpu.matmul %28, %7, %cst_17 {dimension_numbers = #tpu.dot_dimension_numbers<[1], [0], [0], [1], [0, 0, 1, 1], [], []>} : vector<1x64xf32>, vector<64x256xf32>, vector<1x256xf32> -> vector<1x256xf32>
    %39 = arith.addf %37, %38 : vector<1x256xf32>
    %40 = arith.negf %39 : vector<1x256xf32>
    %41 = math.exp %40 : vector<1x256xf32>
    %cst_18 = arith.constant 1.000000e+00 : f32
    %42 = vector.broadcast %cst_18 : f32 to vector<1x256xf32>
    %43 = arith.addf %42, %41 : vector<1x256xf32>
    %44 = arith.divf %42, %43 : vector<1x256xf32>
    %45 = vector.extract_strided_slice %44 {offsets = [0, 0], sizes = [1, 64], strides = [1, 1]} : vector<1x256xf32> to vector<1x64xf32>
    %46 = vector.extract_strided_slice %44 {offsets = [0, 64], sizes = [1, 64], strides = [1, 1]} : vector<1x256xf32> to vector<1x64xf32>
    %47 = vector.extract_strided_slice %44 {offsets = [0, 192], sizes = [1, 64], strides = [1, 1]} : vector<1x256xf32> to vector<1x64xf32>
    %48 = vector.extract_strided_slice %39 {offsets = [0, 128], sizes = [1, 64], strides = [1, 1]} : vector<1x256xf32> to vector<1x64xf32>
    %49 = math.tanh %48 : vector<1x64xf32>
    %50 = arith.mulf %46, %26 : vector<1x64xf32>
    %51 = arith.mulf %45, %49 : vector<1x64xf32>
    %52 = arith.addf %50, %51 : vector<1x64xf32>
    %53 = math.tanh %52 : vector<1x64xf32>
    %54 = arith.mulf %47, %53 : vector<1x64xf32>
    %55 = vector.extract_strided_slice %54 {offsets = [0, 0], sizes = [1, 32], strides = [1, 1]} : vector<1x64xf32> to vector<1x32xf32>
    %56 = arith.index_cast %c1_i32 : i32 to index
    %c0_19 = arith.constant 0 : index
    %57 = vector.load %arg12[%56, %c0_19] : memref<8x32xf32, #tpu.memory_space<vmem>>, vector<1x32xf32>
    tpu.vector_store %arg12[%56, %c0_19], %55 {strides = array<i32>} : memref<8x32xf32, #tpu.memory_space<vmem>>, vector<1x32xf32>,
    %58 = vector.extract_strided_slice %54 {offsets = [0, 32], sizes = [1, 32], strides = [1, 1]} : vector<1x64xf32> to vector<1x32xf32>
    %c7_i32_20 = arith.constant 7 : i32
    %59 = arith.subi %c7_i32_20, %c1_i32 : i32
    %60 = arith.index_cast %59 : i32 to index
    %c0_21 = arith.constant 0 : index
    %61 = vector.load %arg13[%60, %c0_21] : memref<8x32xf32, #tpu.memory_space<vmem>>, vector<1x32xf32>
    tpu.vector_store %arg13[%60, %c0_21], %58 {strides = array<i32>} : memref<8x32xf32, #tpu.memory_space<vmem>>, vector<1x32xf32>,
    %c2_i32 = arith.constant 2 : i32
    %62 = arith.index_cast %c2_i32 : i32 to index
    %c0_22 = arith.constant 0 : index
    %63 = vector.load %arg14[%62, %c0_22] : memref<8x256xf32, #tpu.memory_space<vmem>>, vector<1x256xf32>
    %cst_23 = arith.constant dense<0.000000e+00> : vector<1x256xf32>
    %64 = tpu.matmul %54, %7, %cst_23 {dimension_numbers = #tpu.dot_dimension_numbers<[1], [0], [0], [1], [0, 0, 1, 1], [], []>} : vector<1x64xf32>, vector<64x256xf32>, vector<1x256xf32> -> vector<1x256xf32>
    %65 = arith.addf %63, %64 : vector<1x256xf32>
    %66 = arith.negf %65 : vector<1x256xf32>
    %67 = math.exp %66 : vector<1x256xf32>
    %cst_24 = arith.constant 1.000000e+00 : f32
    %68 = vector.broadcast %cst_24 : f32 to vector<1x256xf32>
    %69 = arith.addf %68, %67 : vector<1x256xf32>
    %70 = arith.divf %68, %69 : vector<1x256xf32>
    %71 = vector.extract_strided_slice %70 {offsets = [0, 0], sizes = [1, 64], strides = [1, 1]} : vector<1x256xf32> to vector<1x64xf32>
    %72 = vector.extract_strided_slice %70 {offsets = [0, 64], sizes = [1, 64], strides = [1, 1]} : vector<1x256xf32> to vector<1x64xf32>
    %73 = vector.extract_strided_slice %70 {offsets = [0, 192], sizes = [1, 64], strides = [1, 1]} : vector<1x256xf32> to vector<1x64xf32>
    %74 = vector.extract_strided_slice %65 {offsets = [0, 128], sizes = [1, 64], strides = [1, 1]} : vector<1x256xf32> to vector<1x64xf32>
    %75 = math.tanh %74 : vector<1x64xf32>
    %76 = arith.mulf %72, %52 : vector<1x64xf32>
    %77 = arith.mulf %71, %75 : vector<1x64xf32>
    %78 = arith.addf %76, %77 : vector<1x64xf32>
    %79 = math.tanh %78 : vector<1x64xf32>
    %80 = arith.mulf %73, %79 : vector<1x64xf32>
    %81 = vector.extract_strided_slice %80 {offsets = [0, 0], sizes = [1, 32], strides = [1, 1]} : vector<1x64xf32> to vector<1x32xf32>
    %82 = arith.index_cast %c2_i32 : i32 to index
    %c0_25 = arith.constant 0 : index
    %83 = vector.load %arg12[%82, %c0_25] : memref<8x32xf32, #tpu.memory_space<vmem>>, vector<1x32xf32>
    tpu.vector_store %arg12[%82, %c0_25], %81 {strides = array<i32>} : memref<8x32xf32, #tpu.memory_space<vmem>>, vector<1x32xf32>,
    %84 = vector.extract_strided_slice %80 {offsets = [0, 32], sizes = [1, 32], strides = [1, 1]} : vector<1x64xf32> to vector<1x32xf32>
    %c7_i32_26 = arith.constant 7 : i32
    %85 = arith.subi %c7_i32_26, %c2_i32 : i32
    %86 = arith.index_cast %85 : i32 to index
    %c0_27 = arith.constant 0 : index
    %87 = vector.load %arg13[%86, %c0_27] : memref<8x32xf32, #tpu.memory_space<vmem>>, vector<1x32xf32>
    tpu.vector_store %arg13[%86, %c0_27], %84 {strides = array<i32>} : memref<8x32xf32, #tpu.memory_space<vmem>>, vector<1x32xf32>,
    %c3_i32 = arith.constant 3 : i32
    %88 = arith.index_cast %c3_i32 : i32 to index
    %c0_28 = arith.constant 0 : index
    %89 = vector.load %arg14[%88, %c0_28] : memref<8x256xf32, #tpu.memory_space<vmem>>, vector<1x256xf32>
    %cst_29 = arith.constant dense<0.000000e+00> : vector<1x256xf32>
    %90 = tpu.matmul %80, %7, %cst_29 {dimension_numbers = #tpu.dot_dimension_numbers<[1], [0], [0], [1], [0, 0, 1, 1], [], []>} : vector<1x64xf32>, vector<64x256xf32>, vector<1x256xf32> -> vector<1x256xf32>
    %91 = arith.addf %89, %90 : vector<1x256xf32>
    %92 = arith.negf %91 : vector<1x256xf32>
    %93 = math.exp %92 : vector<1x256xf32>
    %cst_30 = arith.constant 1.000000e+00 : f32
    %94 = vector.broadcast %cst_30 : f32 to vector<1x256xf32>
    %95 = arith.addf %94, %93 : vector<1x256xf32>
    %96 = arith.divf %94, %95 : vector<1x256xf32>
    %97 = vector.extract_strided_slice %96 {offsets = [0, 0], sizes = [1, 64], strides = [1, 1]} : vector<1x256xf32> to vector<1x64xf32>
    %98 = vector.extract_strided_slice %96 {offsets = [0, 64], sizes = [1, 64], strides = [1, 1]} : vector<1x256xf32> to vector<1x64xf32>
    %99 = vector.extract_strided_slice %96 {offsets = [0, 192], sizes = [1, 64], strides = [1, 1]} : vector<1x256xf32> to vector<1x64xf32>
    %100 = vector.extract_strided_slice %91 {offsets = [0, 128], sizes = [1, 64], strides = [1, 1]} : vector<1x256xf32> to vector<1x64xf32>
    %101 = math.tanh %100 : vector<1x64xf32>
    %102 = arith.mulf %98, %78 : vector<1x64xf32>
    %103 = arith.mulf %97, %101 : vector<1x64xf32>
    %104 = arith.addf %102, %103 : vector<1x64xf32>
    %105 = math.tanh %104 : vector<1x64xf32>
    %106 = arith.mulf %99, %105 : vector<1x64xf32>
    %107 = vector.extract_strided_slice %106 {offsets = [0, 0], sizes = [1, 32], strides = [1, 1]} : vector<1x64xf32> to vector<1x32xf32>
    %108 = arith.index_cast %c3_i32 : i32 to index
    %c0_31 = arith.constant 0 : index
    %109 = vector.load %arg12[%108, %c0_31] : memref<8x32xf32, #tpu.memory_space<vmem>>, vector<1x32xf32>
    tpu.vector_store %arg12[%108, %c0_31], %107 {strides = array<i32>} : memref<8x32xf32, #tpu.memory_space<vmem>>, vector<1x32xf32>,
    %110 = vector.extract_strided_slice %106 {offsets = [0, 32], sizes = [1, 32], strides = [1, 1]} : vector<1x64xf32> to vector<1x32xf32>
    %c7_i32_32 = arith.constant 7 : i32
    %111 = arith.subi %c7_i32_32, %c3_i32 : i32
    %112 = arith.index_cast %111 : i32 to index
    %c0_33 = arith.constant 0 : index
    %113 = vector.load %arg13[%112, %c0_33] : memref<8x32xf32, #tpu.memory_space<vmem>>, vector<1x32xf32>
    tpu.vector_store %arg13[%112, %c0_33], %110 {strides = array<i32>} : memref<8x32xf32, #tpu.memory_space<vmem>>, vector<1x32xf32>,
    %c4_i32 = arith.constant 4 : i32
    %114 = arith.index_cast %c4_i32 : i32 to index
    %c0_34 = arith.constant 0 : index
    %115 = vector.load %arg14[%114, %c0_34] : memref<8x256xf32, #tpu.memory_space<vmem>>, vector<1x256xf32>
    %cst_35 = arith.constant dense<0.000000e+00> : vector<1x256xf32>
    %116 = tpu.matmul %106, %7, %cst_35 {dimension_numbers = #tpu.dot_dimension_numbers<[1], [0], [0], [1], [0, 0, 1, 1], [], []>} : vector<1x64xf32>, vector<64x256xf32>, vector<1x256xf32> -> vector<1x256xf32>
    %117 = arith.addf %115, %116 : vector<1x256xf32>
    %118 = arith.negf %117 : vector<1x256xf32>
    %119 = math.exp %118 : vector<1x256xf32>
    %cst_36 = arith.constant 1.000000e+00 : f32
    %120 = vector.broadcast %cst_36 : f32 to vector<1x256xf32>
    %121 = arith.addf %120, %119 : vector<1x256xf32>
    %122 = arith.divf %120, %121 : vector<1x256xf32>
    %123 = vector.extract_strided_slice %122 {offsets = [0, 0], sizes = [1, 64], strides = [1, 1]} : vector<1x256xf32> to vector<1x64xf32>
    %124 = vector.extract_strided_slice %122 {offsets = [0, 64], sizes = [1, 64], strides = [1, 1]} : vector<1x256xf32> to vector<1x64xf32>
    %125 = vector.extract_strided_slice %122 {offsets = [0, 192], sizes = [1, 64], strides = [1, 1]} : vector<1x256xf32> to vector<1x64xf32>
    %126 = vector.extract_strided_slice %117 {offsets = [0, 128], sizes = [1, 64], strides = [1, 1]} : vector<1x256xf32> to vector<1x64xf32>
    %127 = math.tanh %126 : vector<1x64xf32>
    %128 = arith.mulf %124, %104 : vector<1x64xf32>
    %129 = arith.mulf %123, %127 : vector<1x64xf32>
    %130 = arith.addf %128, %129 : vector<1x64xf32>
    %131 = math.tanh %130 : vector<1x64xf32>
    %132 = arith.mulf %125, %131 : vector<1x64xf32>
    %133 = vector.extract_strided_slice %132 {offsets = [0, 0], sizes = [1, 32], strides = [1, 1]} : vector<1x64xf32> to vector<1x32xf32>
    %134 = arith.index_cast %c4_i32 : i32 to index
    %c0_37 = arith.constant 0 : index
    %135 = vector.load %arg12[%134, %c0_37] : memref<8x32xf32, #tpu.memory_space<vmem>>, vector<1x32xf32>
    tpu.vector_store %arg12[%134, %c0_37], %133 {strides = array<i32>} : memref<8x32xf32, #tpu.memory_space<vmem>>, vector<1x32xf32>,
    %136 = vector.extract_strided_slice %132 {offsets = [0, 32], sizes = [1, 32], strides = [1, 1]} : vector<1x64xf32> to vector<1x32xf32>
    %c7_i32_38 = arith.constant 7 : i32
    %137 = arith.subi %c7_i32_38, %c4_i32 : i32
    %138 = arith.index_cast %137 : i32 to index
    %c0_39 = arith.constant 0 : index
    %139 = vector.load %arg13[%138, %c0_39] : memref<8x32xf32, #tpu.memory_space<vmem>>, vector<1x32xf32>
    tpu.vector_store %arg13[%138, %c0_39], %136 {strides = array<i32>} : memref<8x32xf32, #tpu.memory_space<vmem>>, vector<1x32xf32>,
    %c5_i32 = arith.constant 5 : i32
    %140 = arith.index_cast %c5_i32 : i32 to index
    %c0_40 = arith.constant 0 : index
    %141 = vector.load %arg14[%140, %c0_40] : memref<8x256xf32, #tpu.memory_space<vmem>>, vector<1x256xf32>
    %cst_41 = arith.constant dense<0.000000e+00> : vector<1x256xf32>
    %142 = tpu.matmul %132, %7, %cst_41 {dimension_numbers = #tpu.dot_dimension_numbers<[1], [0], [0], [1], [0, 0, 1, 1], [], []>} : vector<1x64xf32>, vector<64x256xf32>, vector<1x256xf32> -> vector<1x256xf32>
    %143 = arith.addf %141, %142 : vector<1x256xf32>
    %144 = arith.negf %143 : vector<1x256xf32>
    %145 = math.exp %144 : vector<1x256xf32>
    %cst_42 = arith.constant 1.000000e+00 : f32
    %146 = vector.broadcast %cst_42 : f32 to vector<1x256xf32>
    %147 = arith.addf %146, %145 : vector<1x256xf32>
    %148 = arith.divf %146, %147 : vector<1x256xf32>
    %149 = vector.extract_strided_slice %148 {offsets = [0, 0], sizes = [1, 64], strides = [1, 1]} : vector<1x256xf32> to vector<1x64xf32>
    %150 = vector.extract_strided_slice %148 {offsets = [0, 64], sizes = [1, 64], strides = [1, 1]} : vector<1x256xf32> to vector<1x64xf32>
    %151 = vector.extract_strided_slice %148 {offsets = [0, 192], sizes = [1, 64], strides = [1, 1]} : vector<1x256xf32> to vector<1x64xf32>
    %152 = vector.extract_strided_slice %143 {offsets = [0, 128], sizes = [1, 64], strides = [1, 1]} : vector<1x256xf32> to vector<1x64xf32>
    %153 = math.tanh %152 : vector<1x64xf32>
    %154 = arith.mulf %150, %130 : vector<1x64xf32>
    %155 = arith.mulf %149, %153 : vector<1x64xf32>
    %156 = arith.addf %154, %155 : vector<1x64xf32>
    %157 = math.tanh %156 : vector<1x64xf32>
    %158 = arith.mulf %151, %157 : vector<1x64xf32>
    %159 = vector.extract_strided_slice %158 {offsets = [0, 0], sizes = [1, 32], strides = [1, 1]} : vector<1x64xf32> to vector<1x32xf32>
    %160 = arith.index_cast %c5_i32 : i32 to index
    %c0_43 = arith.constant 0 : index
    %161 = vector.load %arg12[%160, %c0_43] : memref<8x32xf32, #tpu.memory_space<vmem>>, vector<1x32xf32>
    tpu.vector_store %arg12[%160, %c0_43], %159 {strides = array<i32>} : memref<8x32xf32, #tpu.memory_space<vmem>>, vector<1x32xf32>,
    %162 = vector.extract_strided_slice %158 {offsets = [0, 32], sizes = [1, 32], strides = [1, 1]} : vector<1x64xf32> to vector<1x32xf32>
    %c7_i32_44 = arith.constant 7 : i32
    %163 = arith.subi %c7_i32_44, %c5_i32 : i32
    %164 = arith.index_cast %163 : i32 to index
    %c0_45 = arith.constant 0 : index
    %165 = vector.load %arg13[%164, %c0_45] : memref<8x32xf32, #tpu.memory_space<vmem>>, vector<1x32xf32>
    tpu.vector_store %arg13[%164, %c0_45], %162 {strides = array<i32>} : memref<8x32xf32, #tpu.memory_space<vmem>>, vector<1x32xf32>,
    %c6_i32 = arith.constant 6 : i32
    %166 = arith.index_cast %c6_i32 : i32 to index
    %c0_46 = arith.constant 0 : index
    %167 = vector.load %arg14[%166, %c0_46] : memref<8x256xf32, #tpu.memory_space<vmem>>, vector<1x256xf32>
    %cst_47 = arith.constant dense<0.000000e+00> : vector<1x256xf32>
    %168 = tpu.matmul %158, %7, %cst_47 {dimension_numbers = #tpu.dot_dimension_numbers<[1], [0], [0], [1], [0, 0, 1, 1], [], []>} : vector<1x64xf32>, vector<64x256xf32>, vector<1x256xf32> -> vector<1x256xf32>
    %169 = arith.addf %167, %168 : vector<1x256xf32>
    %170 = arith.negf %169 : vector<1x256xf32>
    %171 = math.exp %170 : vector<1x256xf32>
    %cst_48 = arith.constant 1.000000e+00 : f32
    %172 = vector.broadcast %cst_48 : f32 to vector<1x256xf32>
    %173 = arith.addf %172, %171 : vector<1x256xf32>
    %174 = arith.divf %172, %173 : vector<1x256xf32>
    %175 = vector.extract_strided_slice %174 {offsets = [0, 0], sizes = [1, 64], strides = [1, 1]} : vector<1x256xf32> to vector<1x64xf32>
    %176 = vector.extract_strided_slice %174 {offsets = [0, 64], sizes = [1, 64], strides = [1, 1]} : vector<1x256xf32> to vector<1x64xf32>
    %177 = vector.extract_strided_slice %174 {offsets = [0, 192], sizes = [1, 64], strides = [1, 1]} : vector<1x256xf32> to vector<1x64xf32>
    %178 = vector.extract_strided_slice %169 {offsets = [0, 128], sizes = [1, 64], strides = [1, 1]} : vector<1x256xf32> to vector<1x64xf32>
    %179 = math.tanh %178 : vector<1x64xf32>
    %180 = arith.mulf %176, %156 : vector<1x64xf32>
    %181 = arith.mulf %175, %179 : vector<1x64xf32>
    %182 = arith.addf %180, %181 : vector<1x64xf32>
    %183 = math.tanh %182 : vector<1x64xf32>
    %184 = arith.mulf %177, %183 : vector<1x64xf32>
    %185 = vector.extract_strided_slice %184 {offsets = [0, 0], sizes = [1, 32], strides = [1, 1]} : vector<1x64xf32> to vector<1x32xf32>
    %186 = arith.index_cast %c6_i32 : i32 to index
    %c0_49 = arith.constant 0 : index
    %187 = vector.load %arg12[%186, %c0_49] : memref<8x32xf32, #tpu.memory_space<vmem>>, vector<1x32xf32>
    tpu.vector_store %arg12[%186, %c0_49], %185 {strides = array<i32>} : memref<8x32xf32, #tpu.memory_space<vmem>>, vector<1x32xf32>,
    %188 = vector.extract_strided_slice %184 {offsets = [0, 32], sizes = [1, 32], strides = [1, 1]} : vector<1x64xf32> to vector<1x32xf32>
    %c7_i32_50 = arith.constant 7 : i32
    %189 = arith.subi %c7_i32_50, %c6_i32 : i32
    %190 = arith.index_cast %189 : i32 to index
    %c0_51 = arith.constant 0 : index
    %191 = vector.load %arg13[%190, %c0_51] : memref<8x32xf32, #tpu.memory_space<vmem>>, vector<1x32xf32>
    tpu.vector_store %arg13[%190, %c0_51], %188 {strides = array<i32>} : memref<8x32xf32, #tpu.memory_space<vmem>>, vector<1x32xf32>,
    %c7_i32_52 = arith.constant 7 : i32
    %192 = arith.index_cast %c7_i32_52 : i32 to index
    %c0_53 = arith.constant 0 : index
    %193 = vector.load %arg14[%192, %c0_53] : memref<8x256xf32, #tpu.memory_space<vmem>>, vector<1x256xf32>
    %cst_54 = arith.constant dense<0.000000e+00> : vector<1x256xf32>
    %194 = tpu.matmul %184, %7, %cst_54 {dimension_numbers = #tpu.dot_dimension_numbers<[1], [0], [0], [1], [0, 0, 1, 1], [], []>} : vector<1x64xf32>, vector<64x256xf32>, vector<1x256xf32> -> vector<1x256xf32>
    %195 = arith.addf %193, %194 : vector<1x256xf32>
    %196 = arith.negf %195 : vector<1x256xf32>
    %197 = math.exp %196 : vector<1x256xf32>
    %cst_55 = arith.constant 1.000000e+00 : f32
    %198 = vector.broadcast %cst_55 : f32 to vector<1x256xf32>
    %199 = arith.addf %198, %197 : vector<1x256xf32>
    %200 = arith.divf %198, %199 : vector<1x256xf32>
    %201 = vector.extract_strided_slice %200 {offsets = [0, 0], sizes = [1, 64], strides = [1, 1]} : vector<1x256xf32> to vector<1x64xf32>
    %202 = vector.extract_strided_slice %200 {offsets = [0, 64], sizes = [1, 64], strides = [1, 1]} : vector<1x256xf32> to vector<1x64xf32>
    %203 = vector.extract_strided_slice %200 {offsets = [0, 192], sizes = [1, 64], strides = [1, 1]} : vector<1x256xf32> to vector<1x64xf32>
    %204 = vector.extract_strided_slice %195 {offsets = [0, 128], sizes = [1, 64], strides = [1, 1]} : vector<1x256xf32> to vector<1x64xf32>
    %205 = math.tanh %204 : vector<1x64xf32>
    %206 = arith.mulf %202, %182 : vector<1x64xf32>
    %207 = arith.mulf %201, %205 : vector<1x64xf32>
    %208 = arith.addf %206, %207 : vector<1x64xf32>
    %209 = math.tanh %208 : vector<1x64xf32>
    %210 = arith.mulf %203, %209 : vector<1x64xf32>
    %211 = vector.extract_strided_slice %210 {offsets = [0, 0], sizes = [1, 32], strides = [1, 1]} : vector<1x64xf32> to vector<1x32xf32>
    %212 = arith.index_cast %c7_i32_52 : i32 to index
    %c0_56 = arith.constant 0 : index
    %213 = vector.load %arg12[%212, %c0_56] : memref<8x32xf32, #tpu.memory_space<vmem>>, vector<1x32xf32>
    tpu.vector_store %arg12[%212, %c0_56], %211 {strides = array<i32>} : memref<8x32xf32, #tpu.memory_space<vmem>>, vector<1x32xf32>,
    %214 = vector.extract_strided_slice %210 {offsets = [0, 32], sizes = [1, 32], strides = [1, 1]} : vector<1x64xf32> to vector<1x32xf32>
    %c7_i32_57 = arith.constant 7 : i32
    %215 = arith.subi %c7_i32_57, %c7_i32_52 : i32
    %216 = arith.index_cast %215 : i32 to index
    %c0_58 = arith.constant 0 : index
    %217 = vector.load %arg13[%216, %c0_58] : memref<8x32xf32, #tpu.memory_space<vmem>>, vector<1x32xf32>
    tpu.vector_store %arg13[%216, %c0_58], %214 {strides = array<i32>} : memref<8x32xf32, #tpu.memory_space<vmem>>, vector<1x32xf32>,
    %c8_i32 = arith.constant 8 : i32
    %c0_59 = arith.constant 0 : index
    %c0_60 = arith.constant 0 : index
    %218 = vector.load %arg12[%c0_59, %c0_60] : memref<8x32xf32, #tpu.memory_space<vmem>>, vector<8x32xf32>
    %c0_61 = arith.constant 0 : index
    %c0_62 = arith.constant 0 : index
    %219 = vector.load %arg13[%c0_61, %c0_62] : memref<8x32xf32, #tpu.memory_space<vmem>>, vector<8x32xf32>
    %220 = tpu.concatenate %218, %219 in 1 : vector<8x32xf32>, vector<8x32xf32> -> vector<8x64xf32>
    %221 = vector.extract_strided_slice %220 {offsets = [2, 0], sizes = [3, 64], strides = [1, 1]} : vector<8x64xf32> to vector<3x64xf32>
    %cst_63 = arith.constant dense<0.000000e+00> : vector<64xf32>
    %222 = vector.multi_reduction <add>, %221, %cst_63 [0] : vector<3x64xf32> to vector<64xf32>
    %223 = vector.shape_cast %222 : vector<64xf32> to vector<1x64xf32>
    %cst_64 = arith.constant 3.000000e+00 : f32
    %224 = vector.broadcast %cst_64 : f32 to vector<1x64xf32>
    %225 = arith.divf %223, %224 : vector<1x64xf32>
    %c0_65 = arith.constant 0 : index
    %c0_66 = arith.constant 0 : index
    %226 = vector.load %arg5[%c0_65, %c0_66] : memref<64x32xf32, #tpu.memory_space<vmem>>, vector<64x32xf32>
    %cst_67 = arith.constant dense<0.000000e+00> : vector<1x32xf32>
    %227 = tpu.matmul %225, %226, %cst_67 {dimension_numbers = #tpu.dot_dimension_numbers<[1], [0], [0], [1], [0, 0, 1, 1], [], []>} : vector<1x64xf32>, vector<64x32xf32>, vector<1x32xf32> -> vector<1x32xf32>
    %c0_68 = arith.constant 0 : index
    %c0_69 = arith.constant 0 : index
    %228 = vector.load %arg6[%c0_68, %c0_69] : memref<1x32xf32, #tpu.memory_space<vmem>>, vector<1x32xf32>
    %229 = arith.addf %227, %228 : vector<1x32xf32>
    %c0_70 = arith.constant 0 : index
    %c0_71 = arith.constant 0 : index
    %230 = vector.load %arg4[%c0_70, %c0_71] : memref<64x32xf32, #tpu.memory_space<vmem>>, vector<64x32xf32>
    %c0_72 = arith.constant 0 : index
    %c0_73 = arith.constant 0 : index
    %231 = vector.load %arg7[%c0_72, %c0_73] : memref<1x32xf32, #tpu.memory_space<vmem>>, vector<1x32xf32>
    %c0_74 = arith.constant 0 : index
    %c0_75 = arith.constant 0 : index
    %232 = vector.load %arg8[%c0_74, %c0_75] : memref<1x1xf32, #tpu.memory_space<vmem>>, vector<1x1xf32>
    %cst_76 = arith.constant 0.000000e+00 : f32
    %233 = vector.broadcast %cst_76 : f32 to vector<1x64xf32>
    %234 = vector.extract_strided_slice %220 {offsets = [0, 0], sizes = [2, 64], strides = [1, 1]} : vector<8x64xf32> to vector<2x64xf32>
    %cst_77 = arith.constant dense<0.000000e+00> : vector<2x32xf32>
    %235 = tpu.matmul %234, %230, %cst_77 {dimension_numbers = #tpu.dot_dimension_numbers<[1], [0], [0], [1], [0, 0, 1, 1], [], []>} : vector<2x64xf32>, vector<64x32xf32>, vector<2x32xf32> -> vector<2x32xf32>
    %236 = vector.broadcast %229 : vector<1x32xf32> to vector<2x32xf32>
    %237 = arith.addf %235, %236 : vector<2x32xf32>
    %238 = math.tanh %237 : vector<2x32xf32>
    %239 = vector.broadcast %231 : vector<1x32xf32> to vector<2x32xf32>
    %240 = arith.mulf %238, %239 : vector<2x32xf32>
    %cst_78 = arith.constant dense<0.000000e+00> : vector<2xf32>
    %241 = vector.multi_reduction <add>, %240, %cst_78 [1] : vector<2x32xf32> to vector<2xf32>
    %242 = vector.shape_cast %241 : vector<2xf32> to vector<2x1xf32>
    %243 = vector.broadcast %232 : vector<1x1xf32> to vector<2x1xf32>
    %244 = arith.addf %242, %243 : vector<2x1xf32>
    %cst_79 = arith.constant dense<0xFF800000> : vector<2xf32>
    %245 = vector.multi_reduction <maximumf>, %244, %cst_79 [1] : vector<2x1xf32> to vector<2xf32>
    %cst_80 = arith.constant 0xFF800000 : f32
    %246 = vector.broadcast %cst_80 : f32 to vector<2xf32>
    %247 = arith.maximumf %246, %245 : vector<2xf32>
    %248 = vector.shape_cast %247 : vector<2xf32> to vector<2x1xf32>
    %249 = arith.subf %244, %248 : vector<2x1xf32>
    %250 = math.exp %249 : vector<2x1xf32>
    %cst_81 = arith.constant dense<0.000000e+00> : vector<2xf32>
    %251 = vector.multi_reduction <add>, %250, %cst_81 [1] : vector<2x1xf32> to vector<2xf32>
    %252 = vector.shape_cast %251 : vector<2xf32> to vector<2x1xf32>
    %253 = arith.divf %250, %252 : vector<2x1xf32>
    %254 = vector.broadcast %253 : vector<2x1xf32> to vector<2x64xf32>
    %255 = arith.mulf %254, %234 : vector<2x64xf32>
    %cst_82 = arith.constant dense<0.000000e+00> : vector<64xf32>
    %256 = vector.multi_reduction <add>, %255, %cst_82 [0] : vector<2x64xf32> to vector<64xf32>
    %257 = vector.shape_cast %256 : vector<64xf32> to vector<1x64xf32>
    %258 = arith.addf %233, %257 : vector<1x64xf32>
    %259 = vector.extract_strided_slice %220 {offsets = [5, 0], sizes = [3, 64], strides = [1, 1]} : vector<8x64xf32> to vector<3x64xf32>
    %cst_83 = arith.constant dense<0.000000e+00> : vector<3x32xf32>
    %260 = tpu.matmul %259, %230, %cst_83 {dimension_numbers = #tpu.dot_dimension_numbers<[1], [0], [0], [1], [0, 0, 1, 1], [], []>} : vector<3x64xf32>, vector<64x32xf32>, vector<3x32xf32> -> vector<3x32xf32>
    %261 = vector.broadcast %229 : vector<1x32xf32> to vector<3x32xf32>
    %262 = arith.addf %260, %261 : vector<3x32xf32>
    %263 = math.tanh %262 : vector<3x32xf32>
    %264 = vector.broadcast %231 : vector<1x32xf32> to vector<3x32xf32>
    %265 = arith.mulf %263, %264 : vector<3x32xf32>
    %cst_84 = arith.constant dense<0.000000e+00> : vector<3xf32>
    %266 = vector.multi_reduction <add>, %265, %cst_84 [1] : vector<3x32xf32> to vector<3xf32>
    %267 = vector.shape_cast %266 : vector<3xf32> to vector<3x1xf32>
    %268 = vector.broadcast %232 : vector<1x1xf32> to vector<3x1xf32>
    %269 = arith.addf %267, %268 : vector<3x1xf32>
    %cst_85 = arith.constant dense<0xFF800000> : vector<3xf32>
    %270 = vector.multi_reduction <maximumf>, %269, %cst_85 [1] : vector<3x1xf32> to vector<3xf32>
    %cst_86 = arith.constant 0xFF800000 : f32
    %271 = vector.broadcast %cst_86 : f32 to vector<3xf32>
    %272 = arith.maximumf %271, %270 : vector<3xf32>
    %273 = vector.shape_cast %272 : vector<3xf32> to vector<3x1xf32>
    %274 = arith.subf %269, %273 : vector<3x1xf32>
    %275 = math.exp %274 : vector<3x1xf32>
    %cst_87 = arith.constant dense<0.000000e+00> : vector<3xf32>
    %276 = vector.multi_reduction <add>, %275, %cst_87 [1] : vector<3x1xf32> to vector<3xf32>
    %277 = vector.shape_cast %276 : vector<3xf32> to vector<3x1xf32>
    %278 = arith.divf %275, %277 : vector<3x1xf32>
    %279 = vector.broadcast %278 : vector<3x1xf32> to vector<3x64xf32>
    %280 = arith.mulf %279, %259 : vector<3x64xf32>
    %cst_88 = arith.constant dense<0.000000e+00> : vector<64xf32>
    %281 = vector.multi_reduction <add>, %280, %cst_88 [0] : vector<3x64xf32> to vector<64xf32>
    %282 = vector.shape_cast %281 : vector<64xf32> to vector<1x64xf32>
    %283 = arith.addf %258, %282 : vector<1x64xf32>
    %c0_89 = arith.constant 0 : index
    %c0_90 = arith.constant 0 : index
    %284 = vector.load %arg9[%c0_89, %c0_90] : memref<64x128xf32, #tpu.memory_space<vmem>>, vector<64x128xf32>
    %cst_91 = arith.constant dense<0.000000e+00> : vector<1x128xf32>
    %285 = tpu.matmul %283, %284, %cst_91 {dimension_numbers = #tpu.dot_dimension_numbers<[1], [0], [0], [1], [0, 0, 1, 1], [], []>} : vector<1x64xf32>, vector<64x128xf32>, vector<1x128xf32> -> vector<1x128xf32>
    %c0_92 = arith.constant 0 : index
    %c0_93 = arith.constant 0 : index
    %286 = vector.load %arg10[%c0_92, %c0_93] : memref<1x128xf32, #tpu.memory_space<vmem>>, vector<1x128xf32>
    %287 = arith.addf %285, %286 : vector<1x128xf32>
    %cst_94 = arith.constant dense<0xFF800000> : vector<1xf32>
    %288 = vector.multi_reduction <maximumf>, %287, %cst_94 [1] : vector<1x128xf32> to vector<1xf32>
    %cst_95 = arith.constant 0xFF800000 : f32
    %289 = vector.broadcast %cst_95 : f32 to vector<1xf32>
    %290 = arith.maximumf %289, %288 : vector<1xf32>
    %291 = vector.shape_cast %290 : vector<1xf32> to vector<1x1xf32>
    %292 = vector.broadcast %291 : vector<1x1xf32> to vector<1x128xf32>
    %293 = arith.subf %287, %292 : vector<1x128xf32>
    %294 = math.exp %293 : vector<1x128xf32>
    %cst_96 = arith.constant dense<0.000000e+00> : vector<1xf32>
    %295 = vector.multi_reduction <add>, %294, %cst_96 [1] : vector<1x128xf32> to vector<1xf32>
    %296 = vector.shape_cast %295 : vector<1xf32> to vector<1x1xf32>
    %297 = vector.broadcast %296 : vector<1x1xf32> to vector<1x128xf32>
    %298 = arith.divf %294, %297 : vector<1x128xf32>
    %c0_97 = arith.constant 0 : index
    %c0_98 = arith.constant 0 : index
    %299 = vector.load %arg11[%c0_97, %c0_98] : memref<1x128xf32, #tpu.memory_space<vmem>>, vector<1x128xf32>
    tpu.vector_store %arg11[%c0_97, %c0_98], %298 {strides = array<i32>} : memref<1x128xf32, #tpu.memory_space<vmem>>, vector<1x128xf32>,
    return
  }
}

</mosaic_0001>

<bundles_post_ra>
// kernel: tpu_custom_call.1
= control target key start
LH: loop header
LB: loop body
LE: loop exit
PB: predicated region body
PF: predicated region fallthrough
CT: control target
= control target key end

     0   :  { %s2615_s0 = inlined_call_operand.vmem [shape: f32[8,32], index: 0, kind: input, shape index: {}]   ;;  %s2616_s1 = inlined_call_operand.vmem [shape: f32[32,256], index: 1, kind: input, shape index: {}]   ;;  %s2617_s2 = inlined_call_operand.vmem [shape: f32[64,256], index: 2, kind: input, shape index: {}]   ;;  %s2618_s3 = inlined_call_operand.vmem [shape: f32[1,256], index: 3, kind: input, shape index: {}]   ;;  %s2619_s4 = inlined_call_operand.vmem [shape: f32[64,32], index: 4, kind: input, shape index: {}]   ;;  %s2620_s5 = inlined_call_operand.vmem [shape: f32[64,32], index: 5, kind: input, shape index: {}]   ;;  %s2621_s6 = inlined_call_operand.vmem [shape: f32[1,32], index: 6, kind: input, shape index: {}]   ;;  %s2622_s7 = inlined_call_operand.vmem [shape: f32[1,32], index: 7, kind: input, shape index: {}]   ;;  %s2623_s8 = inlined_call_operand.<no memory space> [shape: f32[1,1], index: 8, kind: input, shape index: {}]   ;;  %s2624_s9 = inlined_call_operand.hbm [shape: f32[64,128], index: 9, kind: input, shape index: {}]   ;;  %s2625_s10 = inlined_call_operand.vmem [shape: f32[1,128], index: 10, kind: input, shape index: {}]   ;;  %s2626_s11 = inlined_call_operand.hbm [shape: f32[1,128], index: 11, kind: output, shape index: {}]  }
   0x1   :  { %v16_v0 = vstv %s2623_s8 }
   0x2   :  { %17 = vst [vmem:[#allocation5] sm:$0x1] %v16_v0 }
   0x3   :  { %18 = vsyncpa [#allocation7], 0 }
   0x4   :  { %19 = vsyncpa [#allocation8], 0  ;;  %s2126_s19 = smov [#allocation6]   ;;  %s2078_s23 = scalar_lea.hbm %s2624_s9, 1024 }
   0x5   :  { %s43_s20 = sshll.u32 %s2126_s19, 4  ;;  %p2079_p0 = scmp.ne.s32.totalorder %s2624_s9, %s2078_s23  ;;  %s44_s20 = int_to_ptr.vmem [resolvable:$true] %s43_s20 }
   0x6   :  { %p2082_p1 = scmp.lt.u32.totalorder %s2078_s23, %s2624_s9 }
   0x8   :  { %p2084_p2 = pnand %p2082_p1, %p2079_p0 }
   0xa   :  { %2087 = shalt.err (!%p2084_p2)
}
   0xb   :  { %s2088_s8 = scalar_lea.vmem %s44_s20, 1024  ;;  %p2093_p4 = scmp.lt.s32.totalorder %s44_s20, %s44_s20 }
   0xc   :  { %p2089_p3 = scmp.ne.s32.totalorder %s44_s20, %s2088_s8  ;;  %p2094_p5 = scmp.lt.s32.totalorder %s2088_s8, %s2088_s8 }
   0xe   :  { %p2095_p6 = por %p2094_p5, %p2093_p4 }
  0x10   :  { %p2096_p7 = pnand %p2095_p6, %p2089_p3 }
  0x12   :  { %2099 = shalt.err (!%p2096_p7)
}
  0x13   :  { %s2127_s28 = smov 128   ;;  %s2128_s29 = smov 8  }
  0x14   :  { %49 = dma.hbm_to_vmem [thread:$0]  %s2624_s9, 1024, %s44_s20, [#allocation7], %s2127_s28, %s2127_s28, %s2128_s29  }
  0x15   :  { %2122 = dma.done.wait [#allocation7], 1024  }
  0x16   :  { %2123 = vsyncadd [#allocation7], 4294966272  ;;  %v2129_v1 = vmov 0.0   ;;  %v154_v2 = vld [vmem:[%s2617_s2 + $0x8] sm:$0xff]  ;;  %v156_v3 = vld [vmem:[%s2617_s2 + $0x18] sm:$0xff]  ;;  %vm76_vm0 = vcmask 261120   ;;  %v66_v39 = vlaneseq }
  0x17   :  { %144 = vmatprep.mubr.f32.mxu0 %v2129_v1  ;;  %238 = vmatprep.mubr.f32.mxu1 %v2129_v1  ;;  %v153_v4 = vld [vmem:[%s2617_s2] sm:$0xff]  ;;  %v2224_v5 = vpack.c.bf16 %v156_v3, %v154_v2  ;;  %v155_v6 = vld [vmem:[%s2617_s2 + $0x10] sm:$0xff]  ;;  %v57_v7 = vld [vmem:[%s2616_s1 + $0x8] sm:$0xff]  ;;  %v2130_v46 = vmov 1966171168   ;;  %vm292_vm1 = vcmask 253952  }
  0x18   :  { %v59_v8 = vld [vmem:[%s2616_s1 + $0x18] sm:$0xff]  ;;  %v2235_v9 = vpack.c.bf16 %v155_v6, %v153_v4  ;;  %v56_v11 = vld [vmem:[%s2616_s1] sm:$0xff]  ;;  %v58_v12 = vld [vmem:[%s2616_s1 + $0x10] sm:$0xff]  ;;  %v67_v40 = vshrl.u32 %v66_v39, 7  ;;  %v249_v47 = vunpack.c.l.s4 %v2130_v46  ;;  %vm170_vm2 = vcmask 523264   ;;  %s2132_s19 = smov 96  }
  0x19   :  { %v1800_v10 = vpack.c.bf16 %v59_v8, %v57_v7  ;;  %v158_v13 = vld [vmem:[%s2617_s2 + $0x28] sm:$0xff]  ;;  %1809 = vmatprep.subr.bf16.mxu1 %v2224_v5  ;;  %v1802_v14 = vpack.c.bf16 %v58_v12, %v56_v11  ;;  %v160_v15 = vld [vmem:[%s2617_s2 + $0x38] sm:$0xff]  ;;  %v157_v16 = vld [vmem:[%s2617_s2 + $0x20] sm:$0xff]  ;;  %vm2134_vm3 = vmmov 0   ;;  %s2135_s26 = smov 32   ;;  %vm1237_vm4 = vcmask 518144  }
  0x1a   :  { %v159_v17 = vld [vmem:[%s2617_s2 + $0x30] sm:$0xff]  ;;  %1811 = vmatpush1.bf16.msra.mxu1 %v2235_v9  ;;  %v2257_v18 = vpack.c.bf16 %v160_v15, %v158_v13  ;;  %v61_v20 = vld [vmem:[%s2616_s1 + $0x28] sm:$0xff]  ;;  %v63_v21 = vld [vmem:[%s2616_s1 + $0x38] sm:$0xff]  ;;  %v2336_v41 = vsub.s32 0, %v67_v40  ;;  %v72_v43 = vsub.s32 1, %v67_v40  ;;  %v250_v52 = vunpack.c.0.s8 %v249_v47  ;;  %s2137_s29 = smov [#allocation9]  }
  0x1b   :  { %1801 = vmatprep.subr.bf16.mxu0 %v1800_v10  ;;  %v2259_v19 = vpack.c.bf16 %v159_v17, %v157_v16  ;;  %v60_v22 = vld [vmem:[%s2616_s1 + $0x20] sm:$0xff]  ;;  %v1804_v23 = vpack.c.bf16 %v63_v21, %v61_v20  ;;  %v62_v24 = vld [vmem:[%s2616_s1 + $0x30] sm:$0xff]  ;;  %v162_v25 = vld [vmem:[%s2617_s2 + $0x48] sm:$0xff]  ;;  %vm1423_vm5 = vcmask 254976   ;;  %vm1530_vm6 = vcmask 256000   ;;  %s1657_s1 = sshll.u32 %s2137_s29, 4  ;;  %s1658_s1 = int_to_ptr.vmem [resolvable:$true] %s1657_s1 }
  0x1c   :  { %1803 = vmatpush1.bf16.msra.mxu0 %v1802_v14  ;;  %v164_v26 = vld [vmem:[%s2617_s2 + $0x58] sm:$0xff]  ;;  %1813 = vmatprep.subr.bf16.mxu1 %v2257_v18  ;;  %v1806_v27 = vpack.c.bf16 %v62_v24, %v60_v22  ;;  %v161_v29 = vld [vmem:[%s2617_s2 + $0x40] sm:$0xff]  ;;  %v163_v30 = vld [vmem:[%s2617_s2 + $0x50] sm:$0xff]  ;;  %v2342_v53 = vsub.s32 %v250_v52, %v67_v40  ;;  %vm1446_vm7 = vcmask 517120   ;;  %vm1638_vm8 = vcmask 1040384   ;;  %s2104_s30 = scalar_lea.vmem %s1658_s1, 32  ;;  %p2105_p9 = scmp.lt.s32.totalorder %s1658_s1, %s1658_s1 }
  0x1d   :  { %v2280_v28 = vpack.c.bf16 %v164_v26, %v162_v25  ;;  %1805 = vmatprep.subr.bf16.mxu0 %v1804_v23  ;;  %v166_v31 = vld [vmem:[%s2617_s2 + $0x68] sm:$0xff]  ;;  %v168_v32 = vld [vmem:[%s2617_s2 + $0x78] sm:$0xff]  ;;  %v2295_v33 = vpack.c.bf16 %v163_v30, %v161_v29  ;;  %v55_v34 = vld [vmem:[%s2615_s0] sm:$0xff] }
  0x1e   :  { %1815 = vmatpush1.bf16.msra.mxu1 %v2259_v19  ;;  %v2301_v35 = vpack.c.bf16 %v168_v32, %v166_v31  ;;  %v165_v36 = vld [vmem:[%s2617_s2 + $0x60] sm:$0xff]  ;;  %v167_v37 = vld [vmem:[%s2617_s2 + $0x70] sm:$0xff] }
  0x1f   :  { %1817 = vmatprep.subr.bf16.mxu1 %v2280_v28  ;;  %v2312_v38 = vpack.c.bf16 %v167_v37, %v165_v36  ;;  %v64_v42 = vld [vmem:[%s2618_s3] sm:$0x3]  ;;  %s2131_s3 = smov 64  }
  0x20   :  { %1807 = vmatpush1.bf16.msra.mxu0 %v1806_v27  ;;  %v69_v44 = vrot.slane %v64_v42, %v2336_v41  ;;  %v73_v45 = vrot.slane %v64_v42, %v72_v43 }
  0x21   :  { %1825 = vmatprep.subr.bf16.mxu0 %v2224_v5 }
  0x22   :  { %1819 = vmatpush1.bf16.msra.mxu1 %v2295_v33 }
  0x23   :  { %1666 = vmatmul.mubr.msk.f32.vlgmr.msra.gmra.mrb[0].mxu0 %vm76_vm0, %v55_v34  ;;  %1821 = vmatprep.subr.bf16.mxu1 %v2301_v35 }
  0x24   :  { %1827 = vmatpush1.bf16.msra.mxu0 %v2235_v9  ;;  %371 = vmatprep.mubr.f32.mxu0 %v2129_v1 }
  0x25   :  { %1829 = vmatprep.subr.bf16.mxu0 %v2257_v18 }
  0x26   :  { %1823 = vmatpush1.bf16.msra.mxu1 %v2312_v38 }
  0x27   :  { %1841 = vmatprep.subr.bf16.mxu1 %v2224_v5 }
  0x28   :  { %1831 = vmatpush1.bf16.msra.mxu0 %v2259_v19 }
  0x29   :  { %1833 = vmatprep.subr.bf16.mxu0 %v2280_v28  ;;  %239 = vmatmul.mubr.f32.vlgmr.msra.gmra.mrb[0].mxu1 %v2129_v1 }
  0x2a   :  { %1843 = vmatpush1.bf16.msra.mxu1 %v2235_v9  ;;  %503 = vmatprep.mubr.f32.mxu1 %v2129_v1 }
  0x2b   :  { %1845 = vmatprep.subr.bf16.mxu1 %v2257_v18 }
  0x2c   :  { %1835 = vmatpush1.bf16.msra.mxu0 %v2295_v33 }
  0x2d   :  { %1837 = vmatprep.subr.bf16.mxu0 %v2301_v35 }
  0x2e   :  { %1847 = vmatpush1.bf16.msra.mxu1 %v2259_v19 }
  0x2f   :  { %1849 = vmatprep.subr.bf16.mxu1 %v2280_v28 }
  0x30   :  { %1839 = vmatpush1.bf16.msra.mxu0 %v2312_v38 }
  0x31   :  { %1857 = vmatprep.subr.bf16.mxu0 %v2224_v5 }
  0x32   :  { %1851 = vmatpush1.bf16.msra.mxu1 %v2295_v33 }
  0x33   :  { %1853 = vmatprep.subr.bf16.mxu1 %v2301_v35 }
  0x36   :  { %1855 = vmatpush1.bf16.msra.mxu1 %v2312_v38 }
  0x37   :  { %1873 = vmatprep.subr.bf16.mxu1 %v2224_v5 }
  0xf6   :  { %v146_v48 = vpop.f32.mrb[0].mxu0 }
  0xf7   :  { %v147_v49 = vadd.f32 %v146_v48, %v69_v44  ;;  %v148_v50 = vpop.f32.mrb[1].mxu0 }
  0xf8   :  { %v149_v51 = vadd.f32 %v148_v50, %v73_v45 }
  0xf9   :  { %151 = vst [vmem:[#allocation4] sm:$0xff] %v147_v49 }
  0xfa   :  { %152 = vst [vmem:[#allocation4 + $0x8] sm:$0xff] %v149_v51 }
  0xfc   :  { %v240_v54 = vpop.f32.mrb[0].mxu1 }
  0xfd   :  { %v242_v55 = vpop.f32.mrb[1].mxu1 }
  0xfe   :  { %v247_v56 = vcombine.low %v240_v54, %v242_v55 }
 0x100   :  { %v254_v57 = vrot.slane %v247_v56, %v2342_v53 }
 0x101   :  { %v169_v58 = vld [vmem:[#allocation4] ss:$8 sm:$0x3]  ;;  %v304_v22 = vld [vmem:[#allocation4 + $0x1] ss:$8 sm:$0x3] }
 0x102   :  { %v261_v59 = vrot.slane %v254_v57, %v2342_v53  ;;  %v436_v49 = vld [vmem:[#allocation4 + $0x2] ss:$8 sm:$0x3] }
 0x104   :  { %v263_v60 = vadd.f32 %v261_v59, %v169_v58 }
 0x106   :  { %v1667_v61 = vmul.f32 -1.442695, %v263_v60  ;;  %v271_v62 = vrot.slane %v263_v60, 1 }
 0x108   :  { %1998 = vpow2.f32 %v1667_v61 }
 0x109   :  { %2000 = vtanh.f32 %v271_v62 }
 0x112   :  { %v1999_v63 = vpop.eup %1998 }
 0x113   :  { %v267_v0 = vadd.f32 1.0, %v1999_v63  ;;  %v2001_v2 = vpop.eup %2000 }
 0x115   :  { %2002 = vrcp.f32 %v267_v0 }
 0x11f   :  { %v2003_v3 = vpop.eup %2002 }
 0x120   :  { %v275_v4 = vmul.f32 %v2003_v3, %v2001_v2  ;;  %v274_v6 = vmul.f32 0.0, %v2003_v3 }
 0x122   :  { %277 = vrot.lane.b32.xlu0 %v275_v4, %s2131_s3 }
 0x126   :  { %283 = vrot.lane.b32.xlu0 %v2003_v3, %s2131_s3 }
 0x194   :  { %v278_v7 = vpop.permute.xlu0 %277 }
 0x195   :  { %v280_v8 = vadd.f32 %v278_v7, %v274_v6 }
 0x197   :  { %2004 = vtanh.f32 %v280_v8 }
 0x198   :  { %v284_v11 = vpop.permute.xlu0 %283 }
 0x199   :  { %v285_v12 = vrot.slane %v284_v11, 1  ;;  %v568_v11 = vld [vmem:[#allocation4 + $0x3] ss:$8 sm:$0x3] }
 0x1a1   :  { %v2005_v10 = vpop.eup %2004 }
 0x1a2   :  { %288 = vrot.lane.b32.xlu1 %v2005_v10, %s2131_s3 }
 0x214   :  { %v289_v13 = vpop.permute.xlu1 %288 }
 0x215   :  { %v2349_v14 = vmul.f32 %v289_v13, %v285_v12 }
 0x217   :  { %293 = vst.msk [vmem:[#allocation2] sm:$0x1] %vm292_vm1, %v2349_v14  ;;  %1668 = vmatmul.mubr.msk.f32.vlgmr.msra.gmra.mrb[2].mxu0 %vm170_vm2, %v2349_v14 }
 0x218   :  { %1859 = vmatpush1.bf16.msra.mxu0 %v2235_v9  ;;  %635 = vmatprep.mubr.f32.mxu0 %v2129_v1 }
 0x219   :  { %1861 = vmatprep.subr.bf16.mxu0 %v2257_v18 }
 0x21c   :  { %1863 = vmatpush1.bf16.msra.mxu0 %v2259_v19 }
 0x21d   :  { %1865 = vmatprep.subr.bf16.mxu0 %v2280_v28 }
 0x220   :  { %1867 = vmatpush1.bf16.msra.mxu0 %v2295_v33 }
 0x221   :  { %1869 = vmatprep.subr.bf16.mxu0 %v2301_v35 }
 0x224   :  { %1871 = vmatpush1.bf16.msra.mxu0 %v2312_v38 }
 0x225   :  { %1889 = vmatprep.subr.bf16.mxu0 %v2224_v5 }
 0x2ea   :  { %v373_v15 = vpop.f32.mrb[2].mxu0 }
 0x2eb   :  { %v375_v16 = vpop.f32.mrb[3].mxu0 }
 0x2ec   :  { %v380_v17 = vcombine.low %v373_v15, %v375_v16 }
 0x2ee   :  { %v387_v20 = vrot.slane %v380_v17, %v2342_v53 }
 0x2f0   :  { %v394_v21 = vrot.slane %v387_v20, %v2342_v53 }
 0x2f2   :  { %v396_v23 = vadd.f32 %v394_v21, %v304_v22 }
 0x2f4   :  { %v1669_v24 = vmul.f32 -1.442695, %v396_v23  ;;  %v404_v25 = vrot.slane %v396_v23, 1 }
 0x2f6   :  { %2006 = vpow2.f32 %v1669_v24 }
 0x2f7   :  { %2008 = vtanh.f32 %v404_v25 }
 0x300   :  { %v2007_v26 = vpop.eup %2006 }
 0x301   :  { %v400_v27 = vadd.f32 1.0, %v2007_v26  ;;  %v2009_v29 = vpop.eup %2008 }
 0x303   :  { %2010 = vrcp.f32 %v400_v27 }
 0x30d   :  { %v2011_v30 = vpop.eup %2010 }
 0x30e   :  { %416 = vrot.lane.b32.xlu0 %v2011_v30, %s2131_s3  ;;  %v408_v31 = vmul.f32 %v2011_v30, %v2009_v29  ;;  %v407_v32 = vmul.f32 %v2011_v30, %v280_v8 }
 0x310   :  { %410 = vrot.lane.b32.xlu1 %v408_v31, %s2131_s3 }
 0x380   :  { %v417_v39 = vpop.permute.xlu0 %416 }
 0x381   :  { %v418_v40 = vrot.slane %v417_v39, 1  ;;  %v700_v39 = vld [vmem:[#allocation4 + $0x4] ss:$8 sm:$0x3] }
 0x382   :  { %v411_v34 = vpop.permute.xlu1 %410 }
 0x383   :  { %v413_v36 = vadd.f32 %v411_v34, %v407_v32 }
 0x385   :  { %2012 = vtanh.f32 %v413_v36 }
 0x38f   :  { %v2013_v37 = vpop.eup %2012 }
 0x390   :  { %421 = vrot.lane.b32.xlu1 %v2013_v37, %s2131_s3 }
 0x402   :  { %v422_v42 = vpop.permute.xlu1 %421 }
 0x403   :  { %v2369_v43 = vmul.f32 %v422_v42, %v418_v40 }
 0x405   :  { %425 = vst.msk [vmem:[#allocation2 + $0x1] sm:$0x1] %vm292_vm1, %v2369_v43  ;;  %1670 = vmatmul.mubr.msk.f32.vlgmr.msra.gmra.mrb[2].mxu1 %vm170_vm2, %v2369_v43 }
 0x406   :  { %1875 = vmatpush1.bf16.msra.mxu1 %v2235_v9  ;;  %767 = vmatprep.mubr.f32.mxu1 %v2129_v1 }
 0x407   :  { %1877 = vmatprep.subr.bf16.mxu1 %v2257_v18 }
 0x40a   :  { %1879 = vmatpush1.bf16.msra.mxu1 %v2259_v19 }
 0x40b   :  { %1881 = vmatprep.subr.bf16.mxu1 %v2280_v28 }
 0x40e   :  { %1883 = vmatpush1.bf16.msra.mxu1 %v2295_v33 }
 0x40f   :  { %1885 = vmatprep.subr.bf16.mxu1 %v2301_v35 }
 0x412   :  { %1887 = vmatpush1.bf16.msra.mxu1 %v2312_v38 }
 0x413   :  { %1905 = vmatprep.subr.bf16.mxu1 %v2224_v5 }
 0x4d8   :  { %v505_v44 = vpop.f32.mrb[2].mxu1 }
 0x4d9   :  { %v507_v45 = vpop.f32.mrb[3].mxu1 }
 0x4da   :  { %v512_v46 = vcombine.low %v505_v44, %v507_v45 }
 0x4dc   :  { %v519_v47 = vrot.slane %v512_v46, %v2342_v53 }
 0x4de   :  { %v526_v48 = vrot.slane %v519_v47, %v2342_v53 }
 0x4e0   :  { %v528_v50 = vadd.f32 %v526_v48, %v436_v49 }
 0x4e2   :  { %v1671_v51 = vmul.f32 -1.442695, %v528_v50  ;;  %v536_v52 = vrot.slane %v528_v50, 1 }
 0x4e4   :  { %2014 = vpow2.f32 %v1671_v51 }
 0x4e5   :  { %2016 = vtanh.f32 %v536_v52 }
 0x4ee   :  { %v2015_v54 = vpop.eup %2014 }
 0x4ef   :  { %v532_v55 = vadd.f32 1.0, %v2015_v54  ;;  %v2017_v56 = vpop.eup %2016 }
 0x4f1   :  { %2018 = vrcp.f32 %v532_v55 }
 0x4fb   :  { %v2019_v57 = vpop.eup %2018 }
 0x4fc   :  { %548 = vrot.lane.b32.xlu1 %v2019_v57, %s2131_s3  ;;  %v540_v58 = vmul.f32 %v2019_v57, %v2017_v56  ;;  %v539_v59 = vmul.f32 %v2019_v57, %v413_v36 }
 0x4fe   :  { %542 = vrot.lane.b32.xlu0 %v540_v58, %s2131_s3 }
 0x56e   :  { %v549_v63 = vpop.permute.xlu1 %548 }
 0x56f   :  { %v550_v0 = vrot.slane %v549_v63, 1  ;;  %v832_v63 = vld [vmem:[#allocation4 + $0x5] ss:$8 sm:$0x3] }
 0x570   :  { %v543_v60 = vpop.permute.xlu0 %542 }
 0x571   :  { %v545_v61 = vadd.f32 %v543_v60, %v539_v59 }
 0x573   :  { %2020 = vtanh.f32 %v545_v61 }
 0x57d   :  { %v2021_v62 = vpop.eup %2020 }
 0x57e   :  { %553 = vrot.lane.b32.xlu0 %v2021_v62, %s2131_s3 }
 0x5f0   :  { %v554_v2 = vpop.permute.xlu0 %553 }
 0x5f1   :  { %v2389_v3 = vmul.f32 %v554_v2, %v550_v0 }
 0x5f3   :  { %557 = vst.msk [vmem:[#allocation2 + $0x2] sm:$0x1] %vm292_vm1, %v2389_v3  ;;  %1672 = vmatmul.mubr.msk.f32.vlgmr.msra.gmra.mrb[4].mxu0 %vm170_vm2, %v2389_v3 }
 0x5f4   :  { %1891 = vmatpush1.bf16.msra.mxu0 %v2235_v9  ;;  %899 = vmatprep.mubr.f32.mxu0 %v2129_v1 }
 0x5f5   :  { %1893 = vmatprep.subr.bf16.mxu0 %v2257_v18 }
 0x5f8   :  { %1895 = vmatpush1.bf16.msra.mxu0 %v2259_v19 }
 0x5f9   :  { %1897 = vmatprep.subr.bf16.mxu0 %v2280_v28 }
 0x5fc   :  { %1899 = vmatpush1.bf16.msra.mxu0 %v2295_v33 }
 0x5fd   :  { %1901 = vmatprep.subr.bf16.mxu0 %v2301_v35 }
 0x600   :  { %1903 = vmatpush1.bf16.msra.mxu0 %v2312_v38 }
 0x601   :  { %1921 = vmatprep.subr.bf16.mxu0 %v2224_v5 }
 0x6c6   :  { %v637_v4 = vpop.f32.mrb[4].mxu0 }
 0x6c7   :  { %v639_v6 = vpop.f32.mrb[5].mxu0 }
 0x6c8   :  { %v644_v7 = vcombine.low %v637_v4, %v639_v6 }
 0x6ca   :  { %v651_v8 = vrot.slane %v644_v7, %v2342_v53 }
 0x6cc   :  { %v658_v10 = vrot.slane %v651_v8, %v2342_v53 }
 0x6ce   :  { %v660_v12 = vadd.f32 %v658_v10, %v568_v11 }
 0x6d0   :  { %v1673_v13 = vmul.f32 -1.442695, %v660_v12  ;;  %v668_v15 = vrot.slane %v660_v12, 1 }
 0x6d2   :  { %2022 = vpow2.f32 %v1673_v13 }
 0x6d3   :  { %2024 = vtanh.f32 %v668_v15 }
 0x6dc   :  { %v2023_v16 = vpop.eup %2022 }
 0x6dd   :  { %v664_v17 = vadd.f32 1.0, %v2023_v16  ;;  %v2025_v20 = vpop.eup %2024 }
 0x6df   :  { %2026 = vrcp.f32 %v664_v17 }
 0x6e9   :  { %v2027_v21 = vpop.eup %2026 }
 0x6ea   :  { %680 = vrot.lane.b32.xlu0 %v2027_v21, %s2131_s3  ;;  %v672_v5 = vmul.f32 %v2027_v21, %v2025_v20  ;;  %v671_v22 = vmul.f32 %v2027_v21, %v545_v61 }
 0x6ec   :  { %674 = vrot.lane.b32.xlu1 %v672_v5, %s2131_s3  ;;  %v964_v5 = vld [vmem:[#allocation4 + $0x6] ss:$8 sm:$0x3] }
 0x75c   :  { %v681_v26 = vpop.permute.xlu0 %680 }
 0x75d   :  { %v682_v27 = vrot.slane %v681_v26, 1 }
 0x75e   :  { %v675_v23 = vpop.permute.xlu1 %674 }
 0x75f   :  { %v677_v24 = vadd.f32 %v675_v23, %v671_v22 }
 0x761   :  { %2028 = vtanh.f32 %v677_v24 }
 0x76b   :  { %v2029_v25 = vpop.eup %2028 }
 0x76c   :  { %685 = vrot.lane.b32.xlu1 %v2029_v25, %s2131_s3 }
 0x7de   :  { %v686_v29 = vpop.permute.xlu1 %685 }
 0x7df   :  { %v2409_v30 = vmul.f32 %v686_v29, %v682_v27 }
 0x7e1   :  { %689 = vst.msk [vmem:[#allocation2 + $0x3] sm:$0x1] %vm292_vm1, %v2409_v30  ;;  %1674 = vmatmul.mubr.msk.f32.vlgmr.msra.gmra.mrb[4].mxu1 %vm170_vm2, %v2409_v30 }
 0x7e2   :  { %1907 = vmatpush1.bf16.msra.mxu1 %v2235_v9  ;;  %1031 = vmatprep.mubr.f32.mxu1 %v2129_v1 }
 0x7e3   :  { %1909 = vmatprep.subr.bf16.mxu1 %v2257_v18 }
 0x7e6   :  { %1911 = vmatpush1.bf16.msra.mxu1 %v2259_v19 }
 0x7e7   :  { %1913 = vmatprep.subr.bf16.mxu1 %v2280_v28 }
 0x7ea   :  { %1915 = vmatpush1.bf16.msra.mxu1 %v2295_v33 }
 0x7eb   :  { %1917 = vmatprep.subr.bf16.mxu1 %v2301_v35 }
 0x7ee   :  { %1919 = vmatpush1.bf16.msra.mxu1 %v2312_v38 }
 0x8b4   :  { %v769_v31 = vpop.f32.mrb[4].mxu1 }
 0x8b5   :  { %v771_v32 = vpop.f32.mrb[5].mxu1 }
 0x8b6   :  { %v776_v34 = vcombine.low %v769_v31, %v771_v32 }
 0x8b8   :  { %v783_v36 = vrot.slane %v776_v34, %v2342_v53 }
 0x8ba   :  { %v790_v37 = vrot.slane %v783_v36, %v2342_v53 }
 0x8bc   :  { %v792_v40 = vadd.f32 %v790_v37, %v700_v39 }
 0x8be   :  { %v1675_v42 = vmul.f32 -1.442695, %v792_v40  ;;  %v800_v44 = vrot.slane %v792_v40, 1 }
 0x8c0   :  { %2030 = vpow2.f32 %v1675_v42 }
 0x8c1   :  { %2032 = vtanh.f32 %v800_v44 }
 0x8ca   :  { %v2031_v45 = vpop.eup %2030 }
 0x8cb   :  { %v796_v46 = vadd.f32 1.0, %v2031_v45  ;;  %v2033_v47 = vpop.eup %2032 }
 0x8cd   :  { %2034 = vrcp.f32 %v796_v46 }
 0x8d7   :  { %v2035_v48 = vpop.eup %2034 }
 0x8d8   :  { %812 = vrot.lane.b32.xlu1 %v2035_v48, %s2131_s3  ;;  %v804_v49 = vmul.f32 %v2035_v48, %v2033_v47  ;;  %v803_v50 = vmul.f32 %v2035_v48, %v677_v24 }
 0x8da   :  { %806 = vrot.lane.b32.xlu0 %v804_v49, %s2131_s3 }
 0x94a   :  { %v813_v55 = vpop.permute.xlu1 %812 }
 0x94b   :  { %v814_v56 = vrot.slane %v813_v55, 1 }
 0x94c   :  { %v807_v51 = vpop.permute.xlu0 %806 }
 0x94d   :  { %v809_v52 = vadd.f32 %v807_v51, %v803_v50  ;;  %v1096_v50 = vld [vmem:[#allocation4 + $0x7] ss:$8 sm:$0x3] }
 0x94f   :  { %2036 = vtanh.f32 %v809_v52 }
 0x959   :  { %v2037_v54 = vpop.eup %2036 }
 0x95a   :  { %817 = vrot.lane.b32.xlu0 %v2037_v54, %s2131_s3 }
 0x9cc   :  { %v818_v57 = vpop.permute.xlu0 %817 }
 0x9cd   :  { %v2428_v58 = vmul.f32 %v818_v57, %v814_v56 }
 0x9cf   :  { %821 = vst.msk [vmem:[#allocation2 + $0x4] sm:$0x1] %vm292_vm1, %v2428_v58  ;;  %1676 = vmatmul.mubr.msk.f32.vlgmr.msra.gmra.mrb[6].mxu0 %vm170_vm2, %v2428_v58 }
 0x9d0   :  { %1923 = vmatpush1.bf16.msra.mxu0 %v2235_v9  ;;  %1163 = vmatprep.mubr.f32.mxu0 %v2129_v1 }
 0x9d1   :  { %1925 = vmatprep.subr.bf16.mxu0 %v2257_v18 }
 0x9d4   :  { %1927 = vmatpush1.bf16.msra.mxu0 %v2259_v19 }
 0x9d5   :  { %1929 = vmatprep.subr.bf16.mxu0 %v2280_v28 }
 0x9d8   :  { %1931 = vmatpush1.bf16.msra.mxu0 %v2295_v33 }
 0x9d9   :  { %1933 = vmatprep.subr.bf16.mxu0 %v2301_v35 }
 0x9dc   :  { %1935 = vmatpush1.bf16.msra.mxu0 %v2312_v38 }
 0xaa2   :  { %v901_v59 = vpop.f32.mrb[6].mxu0 }
 0xaa3   :  { %v903_v60 = vpop.f32.mrb[7].mxu0 }
 0xaa4   :  { %v908_v61 = vcombine.low %v901_v59, %v903_v60 }
 0xaa6   :  { %v915_v62 = vrot.slane %v908_v61, %v2342_v53  ;;  %v298_v61 = vrot.slane %v2349_v14, %v2336_v41 }
 0xaa8   :  { %v922_v9 = vrot.slane %v915_v62, %v2342_v53  ;;  %v826_v62 = vrot.slane %v2428_v58, %v2336_v41 }
 0xaaa   :  { %v924_v0 = vadd.f32 %v922_v9, %v832_v63 }
 0xaac   :  { %v1677_v18 = vmul.f32 -1.442695, %v924_v0  ;;  %v932_v19 = vrot.slane %v924_v0, 1 }
 0xaae   :  { %2038 = vpow2.f32 %v1677_v18 }
 0xaaf   :  { %2040 = vtanh.f32 %v932_v19 }
 0xab8   :  { %v2039_v2 = vpop.eup %2038 }
 0xab9   :  { %v928_v28 = vadd.f32 1.0, %v2039_v2  ;;  %v2041_v33 = vpop.eup %2040 }
 0xabb   :  { %2042 = vrcp.f32 %v928_v28 }
 0xac5   :  { %v2043_v35 = vpop.eup %2042 }
 0xac6   :  { %944 = vrot.lane.b32.xlu0 %v2043_v35, %s2131_s3  ;;  %v936_v38 = vmul.f32 %v2043_v35, %v2041_v33  ;;  %v935_v4 = vmul.f32 %v2043_v35, %v809_v52  ;;  %v430_v33 = vrot.slane %v2369_v43, %v2336_v41  ;;  %v694_v35 = vrot.slane %v2409_v30, %v2336_v41  ;;  %v1330_v43 = vld [vmem:[%s2619_s4 + $0x8] sm:$0xff]  ;;  %v1331_v30 = vld [vmem:[%s2619_s4 + $0x10] sm:$0xff] }
 0xac8   :  { %938 = vrot.lane.b32.xlu1 %v936_v38, %s2131_s3 }
 0xb38   :  { %v945_v10 = vpop.permute.xlu0 %944 }
 0xb39   :  { %v946_v11 = vrot.slane %v945_v10, 1  ;;  %v2133_v10 = vmov 0.0|0.0  }
 0xb3a   :  { %v939_v6 = vpop.permute.xlu1 %938  ;;  %1948 = vmatprep.subr.bf16.mxu0 %v2133_v10  ;;  %1936 = vmatprep.subr.bf16.mxu1 %v2133_v10 }
 0xb3b   :  { %v941_v7 = vadd.f32 %v939_v6, %v935_v4 }
 0xb3d   :  { %2044 = vtanh.f32 %v941_v7 }
 0xb47   :  { %v2045_v8 = vpop.eup %2044 }
 0xb48   :  { %949 = vrot.lane.b32.xlu1 %v2045_v8, %s2131_s3 }
 0xbba   :  { %v950_v12 = vpop.permute.xlu1 %949 }
 0xbbb   :  { %v2447_v13 = vmul.f32 %v950_v12, %v946_v11  ;;  %v1332_v12 = vld [vmem:[%s2619_s4 + $0x18] sm:$0xff] }
 0xbbd   :  { %953 = vst.msk [vmem:[#allocation2 + $0x5] sm:$0x1] %vm292_vm1, %v2447_v13  ;;  %1678 = vmatmul.mubr.msk.f32.vlgmr.msra.gmra.mrb[6].mxu1 %vm170_vm2, %v2447_v13  ;;  %v958_v38 = vrot.slane %v2447_v13, %v2336_v41 }
 0xbbe   :  { %1740 = vmatprep.mubr.msk.f32.mxu1 %vm2134_vm3, %v2129_v1 }
 0xc90   :  { %v1033_v15 = vpop.f32.mrb[6].mxu1 }
 0xc91   :  { %v1035_v16 = vpop.f32.mrb[7].mxu1 }
 0xc92   :  { %v1040_v17 = vcombine.low %v1033_v15, %v1035_v16  ;;  %v2508_v15 = vpack.c.bf16 %v1332_v12, %v1331_v30 }
 0xc94   :  { %v1047_v20 = vrot.slane %v1040_v17, %v2342_v53  ;;  %v1333_v17 = vld [vmem:[%s2619_s4 + $0x20] sm:$0xff] }
 0xc96   :  { %v1054_v21 = vrot.slane %v1047_v20, %v2342_v53  ;;  %v1334_v20 = vld [vmem:[%s2619_s4 + $0x28] sm:$0xff] }
 0xc98   :  { %v1056_v22 = vadd.f32 %v1054_v21, %v964_v5  ;;  %v1955_v21 = vpack.c.bf16 %v1334_v20, %v1333_v17 }
 0xc9a   :  { %v1679_v23 = vmul.f32 -1.442695, %v1056_v22  ;;  %v1064_v24 = vrot.slane %v1056_v22, 1  ;;  %v1335_v22 = vld [vmem:[%s2619_s4 + $0x30] sm:$0xff] }
 0xc9c   :  { %2046 = vpow2.f32 %v1679_v23  ;;  %v1336_v23 = vld [vmem:[%s2619_s4 + $0x38] sm:$0xff] }
 0xc9d   :  { %2048 = vtanh.f32 %v1064_v24  ;;  %v1958_v24 = vpack.c.bf16 %v1336_v23, %v1335_v22 }
 0xca6   :  { %v2047_v25 = vpop.eup %2046 }
 0xca7   :  { %v1060_v26 = vadd.f32 1.0, %v2047_v25  ;;  %v2049_v27 = vpop.eup %2048 }
 0xca9   :  { %2050 = vrcp.f32 %v1060_v26  ;;  %v1247_v26 = vld [vmem:[%s2620_s5] sm:$0xff] }
 0xcb3   :  { %v2051_v29 = vpop.eup %2050 }
 0xcb4   :  { %1076 = vrot.lane.b32.xlu1 %v2051_v29, %s2131_s3  ;;  %v1068_v31 = vmul.f32 %v2051_v29, %v2049_v27  ;;  %v1067_v32 = vmul.f32 %v2051_v29, %v941_v7  ;;  %v1329_v7 = vld [vmem:[%s2619_s4] sm:$0xff]  ;;  %v1248_v27 = vld [vmem:[%s2620_s5 + $0x8] sm:$0xff] }
 0xcb5   :  { %v2499_v11 = vpack.c.bf16 %v1330_v43, %v1329_v7  ;;  %v1937_v29 = vpack.c.bf16 %v1248_v27, %v1247_v26  ;;  %v1685_v7 = vld [vmem:[#allocation5] ss:$0 sm:$0xff]  ;;  %v1558_v27 = vld [vmem:[#allocation6 + $0x10] sm:$0xff] }
 0xcb6   :  { %1070 = vrot.lane.b32.xlu0 %v1068_v31, %s2131_s3 }
 0xcb7   :  { %1938 = vmatpush3.bf16.msra.mxu1 %v1937_v29  ;;  %v1559_v29 = vld [vmem:[#allocation6 + $0x18] sm:$0xff] }
 0xcb8   :  { %1939 = vmatprep.subr.bf16.mxu1 %v2133_v10 }
 0xd26   :  { %v1077_v39 = vpop.permute.xlu1 %1076 }
 0xd27   :  { %v1078_v40 = vrot.slane %v1077_v39, 1  ;;  %v1252_v39 = vld [vmem:[%s2620_s5 + $0x28] sm:$0xff] }
 0xd28   :  { %v1071_v34 = vpop.permute.xlu0 %1070 }
 0xd29   :  { %v1073_v36 = vadd.f32 %v1071_v34, %v1067_v32  ;;  %v1249_v32 = vld [vmem:[%s2620_s5 + $0x10] sm:$0xff]  ;;  %v1250_v34 = vld [vmem:[%s2620_s5 + $0x18] sm:$0xff] }
 0xd2b   :  { %2052 = vtanh.f32 %v1073_v36 }
 0xd35   :  { %v2053_v37 = vpop.eup %2052 }
 0xd36   :  { %1081 = vrot.lane.b32.xlu0 %v2053_v37, %s2131_s3  ;;  %v1251_v37 = vld [vmem:[%s2620_s5 + $0x20] sm:$0xff] }
 0xda8   :  { %v1082_v42 = vpop.permute.xlu0 %1081 }
 0xda9   :  { %v1084_v44 = vmul.f32 %v1082_v42, %v1078_v40  ;;  %v1943_v40 = vpack.c.bf16 %v1252_v39, %v1251_v37  ;;  %v1562_v37 = vld [vmem:[#allocation6 + $0x30] sm:$0xff]  ;;  %v1563_v39 = vld [vmem:[#allocation6 + $0x38] sm:$0xff] }
 0xdab   :  { %1085 = vst.msk [vmem:[#allocation2 + $0x6] sm:$0x1] %vm292_vm1, %v1084_v44  ;;  %1680 = vmatmul.mubr.msk.f32.vlgmr.msra.gmra.mrb[8].mxu0 %vm170_vm2, %v1084_v44  ;;  %v1090_v9 = vrot.slane %v1084_v44, %v2336_v41  ;;  %v1253_v44 = vld [vmem:[%s2620_s5 + $0x30] sm:$0xff] }
 0xdac   :  { %1950 = vmatpush3.bf16.msra.mxu0 %v2499_v11  ;;  %1759 = vmatprep.mubr.msk.f32.mxu0 %vm2134_vm3, %v2129_v1 }
 0xdad   :  { %1951 = vmatprep.subr.bf16.mxu0 %v2133_v10 }
 0xdb0   :  { %1953 = vmatpush3.bf16.msra.mxu0 %v2508_v15 }
 0xdb1   :  { %1954 = vmatprep.subr.bf16.mxu0 %v2133_v10 }
 0xdb4   :  { %1956 = vmatpush3.bf16.msra.mxu0 %v1955_v21 }
 0xdb5   :  { %1957 = vmatprep.subr.bf16.mxu0 %v2133_v10 }
 0xdb8   :  { %1959 = vmatpush3.bf16.msra.mxu0 %v1958_v24 }
 0xdb9   :  { %1972 = vmatprep.subr.bf16.mxu0 %v2133_v10 }
 0xe7e   :  { %v1165_v45 = vpop.f32.mrb[8].mxu0 }
 0xe7f   :  { %v1167_v46 = vpop.f32.mrb[9].mxu0 }
 0xe80   :  { %v1172_v47 = vcombine.low %v1165_v45, %v1167_v46  ;;  %v1254_v45 = vld [vmem:[%s2620_s5 + $0x38] sm:$0xff] }
 0xe81   :  { %v1946_v46 = vpack.c.bf16 %v1254_v45, %v1253_v44 }
 0xe82   :  { %v1179_v48 = vrot.slane %v1172_v47, %v2342_v53 }
 0xe84   :  { %v1186_v49 = vrot.slane %v1179_v48, %v2342_v53  ;;  %v562_v53 = vrot.slane %v2389_v3, %v2336_v41 }
 0xe86   :  { %v1188_v51 = vadd.f32 %v1186_v49, %v1096_v50 }
 0xe88   :  { %v1681_v52 = vmul.f32 -1.442695, %v1188_v51  ;;  %v1196_v54 = vrot.slane %v1188_v51, 1 }
 0xe8a   :  { %2054 = vpow2.f32 %v1681_v52 }
 0xe8b   :  { %2056 = vtanh.f32 %v1196_v54 }
 0xe94   :  { %v2055_v55 = vpop.eup %2054 }
 0xe95   :  { %v1192_v56 = vadd.f32 1.0, %v2055_v55  ;;  %v2057_v57 = vpop.eup %2056 }
 0xe97   :  { %2058 = vrcp.f32 %v1192_v56 }
 0xea1   :  { %v2059_v59 = vpop.eup %2058 }
 0xea2   :  { %1208 = vrot.lane.b32.xlu0 %v2059_v59, %s2131_s3  ;;  %v1200_v60 = vmul.f32 %v2059_v59, %v2057_v57  ;;  %v1199_v0 = vmul.f32 %v2059_v59, %v1073_v36  ;;  %v1940_v36 = vpack.c.bf16 %v1250_v34, %v1249_v32  ;;  %v1560_v32 = vld [vmem:[#allocation6 + $0x20] sm:$0xff]  ;;  %v1561_v34 = vld [vmem:[#allocation6 + $0x28] sm:$0xff] }
 0xea4   :  { %1202 = vrot.lane.b32.xlu1 %v1200_v60, %s2131_s3  ;;  %1941 = vmatpush3.bf16.msra.mxu1 %v1940_v36  ;;  %v1979_v36 = vpack.c.bf16 %v1561_v34, %v1560_v32 }
 0xea5   :  { %1942 = vmatprep.subr.bf16.mxu1 %v2133_v10 }
 0xea6   :  { %299 = vrot.lane.b32.xlu0 %v298_v61, %s2132_s19 }
 0xea8   :  { %1944 = vmatpush3.bf16.msra.mxu1 %v1943_v40  ;;  %v1982_v40 = vpack.c.bf16 %v1563_v39, %v1562_v37 }
 0xea9   :  { %1945 = vmatprep.subr.bf16.mxu1 %v2133_v10 }
 0xeaa   :  { %563 = vrot.lane.b32.xlu0 %v562_v53, %s2132_s19 }
 0xeac   :  { %1947 = vmatpush3.bf16.msra.mxu1 %v1946_v46 }
 0xead   :  { %1960 = vmatprep.subr.bf16.mxu1 %v2133_v10 }
 0xeae   :  { %827 = vrot.lane.b32.xlu0 %v826_v62, %s2132_s19 }
 0xeb2   :  { %1091 = vrot.lane.b32.xlu0 %v1090_v9, %s2132_s19 }
 0xf14   :  { %v1209_v63 = vpop.permute.xlu0 %1208 }
 0xf15   :  { %v1210_v4 = vrot.slane %v1209_v63, 1 }
 0xf16   :  { %v1203_v14 = vpop.permute.xlu1 %1202 }
 0xf17   :  { %v1205_v18 = vadd.f32 %v1203_v14, %v1199_v0 }
 0xf18   :  { %v300_v19 = vpop.permute.xlu0 %299 }
 0xf19   :  { %2060 = vtanh.f32 %v1205_v18  ;;  %302 = vst.msk [vmem:[#allocation3 + $0x7] sm:$0x1] %vm292_vm1, %v300_v19  ;;  %v1684_v19 = vld [vmem:[%s2622_s7] ss:$0 sm:$0xff] }
 0xf1c   :  { %v564_v3 = vpop.permute.xlu0 %563 }
 0xf1d   :  { %566 = vst.msk [vmem:[#allocation3 + $0x5] sm:$0x1] %vm292_vm1, %v564_v3 }
 0xf20   :  { %v828_v2 = vpop.permute.xlu0 %827 }
 0xf21   :  { %830 = vst.msk [vmem:[#allocation3 + $0x3] sm:$0x1] %vm292_vm1, %v828_v2 }
 0xf23   :  { %v2061_v58 = vpop.eup %2060 }
 0xf24   :  { %1213 = vrot.lane.b32.xlu1 %v2061_v58, %s2131_s3  ;;  %v1092_v28 = vpop.permute.xlu0 %1091 }
 0xf25   :  { %1094 = vst.msk [vmem:[#allocation3 + $0x1] sm:$0x1] %vm292_vm1, %v1092_v28 }
 0xf28   :  { %431 = vrot.lane.b32.xlu1 %v430_v33, %s2132_s19 }
 0xf2c   :  { %695 = vrot.lane.b32.xlu1 %v694_v35, %s2132_s19 }
 0xf30   :  { %959 = vrot.lane.b32.xlu1 %v958_v38, %s2132_s19 }
 0xf96   :  { %v1214_v6 = vpop.permute.xlu1 %1213 }
 0xf97   :  { %v1216_v8 = vmul.f32 %v1214_v6, %v1210_v4 }
 0xf99   :  { %1217 = vst.msk [vmem:[#allocation2 + $0x7] sm:$0x1] %vm292_vm1, %v1216_v8  ;;  %v1222_v13 = vrot.slane %v1216_v8, %v2336_v41 }
 0xf9a   :  { %v432_v16 = vpop.permute.xlu1 %431 }
 0xf9b   :  { %434 = vst.msk [vmem:[#allocation3 + $0x6] sm:$0x1] %vm292_vm1, %v432_v16  ;;  %1223 = vrot.lane.b32.xlu1 %v1222_v13, %s2132_s19 }
 0xf9e   :  { %v696_v5 = vpop.permute.xlu1 %695 }
 0xf9f   :  { %698 = vst.msk [vmem:[#allocation3 + $0x4] sm:$0x1] %vm292_vm1, %v696_v5 }
 0xfa0   :  { %v1227_v48 = vld [vmem:[#allocation2] sm:$0xff] }
 0xfa2   :  { %v960_v25 = vpop.permute.xlu1 %959 }
 0xfa3   :  { %962 = vst.msk [vmem:[#allocation3 + $0x2] sm:$0x1] %vm292_vm1, %v960_v25  ;;  %v1557_v25 = vld [vmem:[#allocation6 + $0x8] sm:$0xff] }
0x100d   :  { %v1224_v31 = vpop.permute.xlu1 %1223 }
0x100e   :  { %1226 = vst.msk [vmem:[#allocation3] sm:$0x1] %vm292_vm1, %v1224_v31  ;;  %v1976_v31 = vpack.c.bf16 %v1559_v29, %v1558_v27 }
0x1015   :  { %v1228_v42 = vld [vmem:[#allocation3] sm:$0xff] }
0x1016   :  { %1230 = vrot.lane.b32.xlu0 %v1228_v42, %s2135_s26 }
0x1088   :  { %v1231_v47 = vpop.permute.xlu0 %1230 }
0x1089   :  { %v2565_v49 = vsel %vm76_vm0, %v1227_v48, %v1231_v47 }
0x108a   :  { %v1235_v50 = vrot.slane %v2565_v49, 2  ;;  %1760 = vmatmul.mubr.msk.f32.vlgmr.msra.gmra.mrb[10].mxu0 %vm170_vm2, %v2565_v49  ;;  %v1455_v61 = vrot.slane %v2565_v49, 5 }
0x108b   :  { %1797 = vmatprep.mubr.msk.f32.mxu0 %vm2134_vm3, %v2129_v1 }
0x108c   :  { %v1238_v51 = vsel %vm1237_vm4, %v1235_v50, 0.0 }
0x108d   :  { %v1239_v52 = vrot.slane %v1238_v51, 4 }
0x108f   :  { %v1240_v54 = vadd.f32 %v1239_v52, %v1238_v51 }
0x1091   :  { %v1241_v55 = vrot.slane %v1240_v54, 2 }
0x1093   :  { %v1242_v56 = vadd.f32 %v1241_v55, %v1240_v54 }
0x1095   :  { %v1243_v57 = vrot.slane %v1242_v56, 1 }
0x1097   :  { %v1244_v59 = vadd.f32 %v1243_v57, %v1242_v56 }
0x1099   :  { %v1246_v60 = vmul.f32 0.33333334, %v1244_v59 }
0x109b   :  { %1741 = vmatmul.mubr.msk.f32.vlgmr.msra.gmra.mrb[8].mxu1 %vm170_vm2, %v1246_v60 }
0x109c   :  { %1962 = vmatpush3.bf16.msra.mxu1 %v2499_v11  ;;  %1778 = vmatprep.mubr.msk.f32.mxu1 %vm2134_vm3, %v2129_v1  ;;  %v1255_v1 = vld [vmem:[%s2621_s6] sm:$0x1] }
0x109d   :  { %1963 = vmatprep.subr.bf16.mxu1 %v2133_v10 }
0x10a0   :  { %1965 = vmatpush3.bf16.msra.mxu1 %v2508_v15 }
0x10a1   :  { %1966 = vmatprep.subr.bf16.mxu1 %v2133_v10 }
0x10a4   :  { %1968 = vmatpush3.bf16.msra.mxu1 %v1955_v21 }
0x10a5   :  { %1969 = vmatprep.subr.bf16.mxu1 %v2133_v10 }
0x10a8   :  { %1971 = vmatpush3.bf16.msra.mxu1 %v1958_v24  ;;  %v1556_v24 = vld [vmem:[#allocation6] sm:$0xff] }
0x10a9   :  { %v1973_v26 = vpack.c.bf16 %v1557_v25, %v1556_v24 }
0x10ab   :  { %1779 = vmatmul.mubr.msk.f32.vlgmr.msra.gmra.mrb[10].mxu1 %vm170_vm2, %v1455_v61  ;;  %1974 = vmatpush3.bf16.msra.mxu0 %v1973_v26 }
0x10ac   :  { %1975 = vmatprep.subr.bf16.mxu0 %v2133_v10 }
0x10af   :  { %1977 = vmatpush3.bf16.msra.mxu0 %v1976_v31 }
0x10b0   :  { %1978 = vmatprep.subr.bf16.mxu0 %v2133_v10 }
0x10b3   :  { %1980 = vmatpush3.bf16.msra.mxu0 %v1979_v36 }
0x10b4   :  { %1981 = vmatprep.subr.bf16.mxu0 %v2133_v10 }
0x10b7   :  { %1983 = vmatpush3.bf16.msra.mxu0 %v1982_v40 }
0x115d   :  { %v1411_v53 = vpop.f32.mrb[10].mxu0 }
0x115e   :  { %v1761_v62 = vpop.f32.mrb[11].mxu0 }
0x116e   :  { %v1325_v9 = vpop.f32.mrb[8].mxu1 }
0x116f   :  { %v1326_v63 = vadd.f32 %v1325_v9, %v1255_v1  ;;  %v1742_v0 = vpop.f32.mrb[9].mxu1 }
0x1171   :  { %v1342_v14 = vrot.slane %v1326_v63, %v2336_v41  ;;  %v2136_v41 = vmov 0  }
0x1172   :  { %1996 = vset.pattern.permute.xlu0 %v2136_v41  ;;  %1997 = vset.pattern.permute.xlu1 %v2136_v41 }
0x1173   :  { %v1412_v18 = vadd.f32 %v1411_v53, %v1342_v14 }
0x1175   :  { %2062 = vtanh.f32 %v1412_v18 }
0x117e   :  { %v1524_v3 = vpop.f32.mrb[10].mxu1 }
0x117f   :  { %v2063_v2 = vpop.eup %2062  ;;  %v1525_v58 = vadd.f32 %v1524_v3, %v1342_v14  ;;  %v1780_v28 = vpop.f32.mrb[11].mxu1 }
0x1180   :  { %v1422_v33 = vmul.f32 %v2063_v2, %v1684_v19 }
0x1181   :  { %2064 = vtanh.f32 %v1525_v58 }
0x1182   :  { %v1424_v35 = vsel %vm1423_vm5, %v1422_v33, 0.0 }
0x1183   :  { %1425 = vadd.xlane.f32.xlu1 %v1424_v35 }
0x118b   :  { %v2065_v38 = vpop.eup %2064 }
0x118c   :  { %v1529_v4 = vmul.f32 %v2065_v38, %v1684_v19 }
0x118e   :  { %v1531_v6 = vsel %vm1530_vm6, %v1529_v4, 0.0 }
0x118f   :  { %1532 = vadd.xlane.f32.xlu0 %v1531_v6 }
0x1210   :  { %v1426_v43 = vpop.xlane.xlu1 %1425 }
0x1211   :  { %v1433_v30 = vadd.f32 %v1685_v7, %v1426_v43 }
0x1213   :  { %v1434_v8 = vsub.f32 %v1433_v30, %v1433_v30 }
0x1215   :  { %v1435_v11 = vmul.f32 1.442695, %v1434_v8 }
0x1217   :  { %2066 = vpow2.f32 %v1435_v11 }
0x121c   :  { %v1533_v12 = vpop.xlane.xlu0 %1532 }
0x121d   :  { %v1534_v13 = vadd.f32 %v1685_v7, %v1533_v12 }
0x121f   :  { %v1535_v15 = vsub.f32 %v1534_v13, %v1534_v13 }
0x1221   :  { %v2067_v16 = vpop.eup %2066  ;;  %v1536_v17 = vmul.f32 1.442695, %v1535_v15 }
0x1222   :  { %2068 = vrcp.f32 %v2067_v16 }
0x1223   :  { %2070 = vpow2.f32 %v1536_v17 }
0x122c   :  { %v2069_v20 = vpop.eup %2068 }
0x122d   :  { %v2071_v21 = vpop.eup %2070  ;;  %v1439_v5 = vmul.f32 %v2069_v20, %v2067_v16 }
0x122e   :  { %2072 = vrcp.f32 %v2071_v21 }
0x122f   :  { %1442 = vperm.xlu0 %1996, %v1439_v5  }
0x1238   :  { %v2073_v22 = vpop.eup %2072 }
0x1239   :  { %v1540_v23 = vmul.f32 %v2073_v22, %v2071_v21 }
0x123b   :  { %1543 = vperm.xlu1 %1997, %v1540_v23  }
0x12ae   :  { %v1443_v42 = vpop.permute.xlu0 %1442 }
0x12af   :  { %v1445_v44 = vmul.f32 %v1443_v42, %v2565_v49  ;;  %v1564_v49 = vld [vmem:[%s2625_s10] sm:$0x1]  ;;  %s2100_s10 = scalar_lea.vmem %s1658_s1, 16 }
0x12b0   :  { %p2101_p8 = scmp.ne.s32.totalorder %s1658_s1, %s2100_s10  ;;  %p2106_p10 = scmp.lt.s32.totalorder %s2104_s30, %s2100_s10 }
0x12b1   :  { %v1447_v45 = vsel %vm1446_vm7, %v1445_v44, 0.0 }
0x12b2   :  { %v1448_v46 = vrot.slane %v1447_v45, 4  ;;  %p2107_p11 = por %p2106_p10, %p2105_p9 }
0x12b4   :  { %v1449_v47 = vadd.f32 %v1448_v46, %v1447_v45  ;;  %p2108_p12 = pnand %p2107_p11, %p2101_p8 }
0x12b6   :  { %v1450_v51 = vrot.slane %v1449_v47, 2 }
0x12b8   :  { %v1451_v10 = vadd.f32 %v1450_v51, %v1449_v47 }
0x12ba   :  { %v1544_v48 = vpop.permute.xlu1 %1543  ;;  %v1452_v57 = vrot.slane %v1451_v10, 1 }
0x12bb   :  { %v1547_v50 = vmul.f32 %v1544_v48, %v1455_v61 }
0x12bc   :  { %v1453_v53 = vadd.f32 %v1452_v57, %v1451_v10 }
0x12bd   :  { %v1548_v52 = vsel %vm1237_vm4, %v1547_v50, 0.0 }
0x12be   :  { %v1549_v54 = vrot.slane %v1548_v52, 4 }
0x12c0   :  { %v1550_v55 = vadd.f32 %v1549_v54, %v1548_v52 }
0x12c2   :  { %v1551_v56 = vrot.slane %v1550_v55, 2 }
0x12c4   :  { %v1552_v59 = vadd.f32 %v1551_v56, %v1550_v55 }
0x12c6   :  { %v1553_v60 = vrot.slane %v1552_v59, 1 }
0x12c8   :  { %v1554_v62 = vadd.f32 %v1553_v60, %v1552_v59 }
0x12ca   :  { %v1555_v1 = vadd.f32 %v1554_v62, %v1453_v53 }
0x12cc   :  { %1798 = vmatmul.mubr.msk.f32.vlgmr.msra.gmra.mrb[12].mxu0 %vm170_vm2, %v1555_v1 }
0x139f   :  { %v1634_v61 = vpop.f32.mrb[12].mxu0 }
0x13a0   :  { %v1635_v9 = vadd.f32 %v1634_v61, %v1564_v49  ;;  %v1799_v63 = vpop.f32.mrb[13].mxu0 }
0x13a2   :  { %v1639_v0 = vsel %vm1638_vm8, %v1635_v9, -inf }
0x13a3   :  { %1640 = vmax.xlane.f32.xlu1 %v1639_v0 }
0x1430   :  { %v1641_v14 = vpop.xlane.xlu1 %1640 }
0x1431   :  { %v1642_v18 = vsub.f32 %v1635_v9, %v1641_v14 }
0x1433   :  { %v1643_v19 = vmul.f32 1.442695, %v1642_v18 }
0x1435   :  { %2074 = vpow2.f32 %v1643_v19 }
0x143f   :  { %v2075_v3 = vpop.eup %2074 }
0x1440   :  { %v1645_v2 = vsel %vm1638_vm8, %v2075_v3, 0.0 }
0x1441   :  { %1646 = vadd.xlane.f32.xlu0 %v1645_v2 }
0x14ce   :  { %v1647_v58 = vpop.xlane.xlu0 %1646 }
0x14cf   :  { %2076 = vrcp.f32 %v1647_v58 }
0x14d9   :  { %v2077_v28 = vpop.eup %2076 }
0x14da   :  { %v1649_v33 = vmul.f32 %v2077_v28, %v2075_v3 }
0x14dc   :  { %1650 = vst [vmem:[#allocation9] sm:$0x1] %v1649_v33 }
0x14dd   :  { %2111 = shalt.err (!%p2108_p12)
}
0x14de   :  { %s2112_s14 = scalar_lea.hbm %s2626_s11, 16 }
0x14df   :  { %p2113_p13 = scmp.ne.s32.totalorder %s2626_s11, %s2112_s14  ;;  %p2116_p0 = scmp.lt.u32.totalorder %s2112_s14, %s2626_s11 }
0x14e1   :  { %p2118_p1 = pnand %p2116_p0, %p2113_p13 }
0x14e3   :  { %2121 = shalt.err (!%p2118_p1)
}
0x14e4   :  { %1660 = dma.vmem_to_hbm [thread:$0]  %s1658_s1, 16, %s2626_s11, [#allocation8]  }
0x14e5   :  { %2124 = dma.done.wait [#allocation8], 16  }
0x14e6   :  { %2125 = vsyncadd [#allocation8], 4294967280 }
0x14e7   :  { %1664 = vsyncpa [#allocation7], 1 }
0x14e8   :  { %1665 = vsyncpa [#allocation8], 1 }

</bundles_post_ra>
